<compile_context>
chip_gen: v7x
topology: tpu7x:2x2x1
jax: 0.10.0
libtpu: 0.0.40
codegen_flags: <defaults>
</compile_context>

<pallas_src>
import jax
import jax.numpy as jnp
import numpy as np
from jax.experimental import pallas as pl
from jax.experimental.pallas import tpu as pltpu


def _round_up(x, m):
    return (x + m - 1) // m * m


_TM_MAX = 2048  # per-step VMEM at tm=2048 is ~6 MiB -- fine on v5e/v6e/v7x


def _choose_tm(batch):
    """Batch-tile size.

    - small batches: a single 16-aligned tile (minimal padding; the kernel is
      step-overhead dominated anyway).
    - large batches: tiles up to _TM_MAX to amortize the ~0.35us/step pipeline
      overhead, but always >=2 tiles so v7x megacore can shard the grid, and
      tm derived from the tile count so Bp padding waste stays bounded.
    """
    if batch <= 128:
        return _round_up(batch, 16)
    n_tiles = max(2, pl.cdiv(batch, _TM_MAX))
    return _round_up(pl.cdiv(batch, n_tiles), 16)


# ---------------------------------------------------------------------------
# Fused Pallas kernel:  out = ReLU(one_hot(ids) @ G + bconv) @ Wdec
#   (decode bias rides in Wdec via a spare "always-1" channel)
# ---------------------------------------------------------------------------
def _fused_textcnn_kernel(ids_ref, g_ref, bc_ref, wd_ref, o_ref):
    # ids_ref: (TM, L)       int32  token ids (batch tile)
    # g_ref  : (L, Vp, Cp)   bf16   embedding+conv+avgpool folded weight
    # bc_ref : (1, Cp)       f32    conv biases; padded slot Ct holds 1.0
    # wd_ref : (Cp, Np)      bf16   decode weight; row Ct holds the decode bias
    # o_ref  : (TM, Np)      f32    padded logits (lane-dense store)
    ids = ids_ref[...]
    tm = ids.shape[0]
    seq_len, vp, cp = g_ref.shape

    # Hoisted iota: one (TM, Vp) int32 lane index reused for every position.
    lane = jax.lax.broadcasted_iota(jnp.int32, (tm, vp), 1)

    acc = jnp.zeros((tm, cp), jnp.float32)
    for l in range(seq_len):                      # static unroll (small L)
        onehot = jnp.where(lane == ids[:, l:l + 1], 1.0, 0.0).astype(jnp.bfloat16)
        acc = acc + jnp.dot(onehot, g_ref[l], preferred_element_type=jnp.float32)

    h = jnp.maximum(acc + bc_ref[...], 0.0)       # ReLU(avgpool(conv(emb))) in f32
    o_ref[...] = jnp.dot(h.astype(jnp.bfloat16), wd_ref[...],
                         preferred_element_type=jnp.float32)


def _fused_pallas_call(ids_pad, g, bconv, wdec, tm):
    bp, seq_len = ids_pad.shape
    _, vp, cp = g.shape
    np_ = wdec.shape[1]

    flops = 2 * bp * (seq_len * vp) * cp + 2 * bp * cp * np_
    bytes_accessed = (ids_pad.size * 4 + g.size * 2 + bconv.size * 4
                      + wdec.size * 2 + bp * np_ * 4)

    return pl.pallas_call(
        _fused_textcnn_kernel,
        out_shape=jax.ShapeDtypeStruct((bp, np_), jnp.float32),
        grid_spec=pltpu.PrefetchScalarGridSpec(
            num_scalar_prefetch=0,
            grid=(bp // tm,),
            in_specs=[
                pl.BlockSpec((tm, seq_len), lambda i: (i, 0)),     # batch-tiled ids
                pl.BlockSpec((seq_len, vp, cp), lambda i: (0, 0, 0)),  # resident weight
                pl.BlockSpec((1, cp), lambda i: (0, 0)),           # conv bias (+1 slot)
                pl.BlockSpec((cp, np_), lambda i: (0, 0)),         # decode W (+bias row)
            ],
            out_specs=pl.BlockSpec((tm, np_), lambda i: (i, 0)),
        ),
        compiler_params=pltpu.CompilerParams(
            dimension_semantics=("parallel",),          # megacore-shardable on v7x
            vmem_limit_bytes=32 * 1024 * 1024),         # v5e default is only 16 MiB
        cost_estimate=pl.CostEstimate(
            flops=int(flops), transcendentals=0,
            bytes_accessed=int(bytes_accessed)),
    )(ids_pad, g, bconv, wdec)


# ---------------------------------------------------------------------------
# One-time parameter folding (hoisted out of the per-call forward path)
# ---------------------------------------------------------------------------
def prepare_fused_params(params, seq_len):
    """Fold embedding + conv + avg-pool into one (L, Vp, Cp) weight; pad for MXU."""
    L = int(seq_len)
    table = params["embedding"].astype(jnp.float32)          # (V, E)
    V, E = table.shape

    w_cols, b_cols = [], []
    for w, b in zip(params["conv_w"], params["conv_b"]):
        C, _, k = w.shape
        lout = L - k + 1
        wj = jnp.transpose(w, (2, 1, 0))                      # (k, E, C)
        weff = jnp.zeros((L, E, C), jnp.float32)
        for j in range(k):                                    # position l gets w[...,j]
            weff = weff.at[j:j + lout].add(wj[j])             # iff 0 <= l-j < lout
        w_cols.append(weff / lout)
        b_cols.append(b)
    weff = jnp.concatenate(w_cols, axis=2)                    # (L, E, Ct)
    bconv = jnp.concatenate(b_cols)                           # (Ct,)
    Ct = weff.shape[2]

    # Fold the embedding table in: G[l, v, c] = sum_e table[v, e] * Weff[l, e, c]
    g = jnp.einsum("ve,lec->lvc", table, weff)                # (L, V, Ct)

    n_out = params["dec_w"].shape[1]
    Vp = _round_up(V, 128)
    Cp = _round_up(Ct + 1, 128)   # +1 reserves a spare channel for the decode bias
    Np = _round_up(n_out, 128)

    g_p = jnp.zeros((L, Vp, Cp), jnp.float32).at[:, :V, :Ct].set(g)
    # Spare channel Ct: zero conv weight + bias 1.0 -> ReLU keeps it at 1.0, so
    # row Ct of the decode weight carries the decode bias (folded for free).
    bconv_p = (jnp.zeros((1, Cp), jnp.float32)
               .at[0, :Ct].set(bconv)
               .at[0, Ct].set(1.0))
    wdec_p = (jnp.zeros((Cp, Np), jnp.float32)
              .at[:Ct, :n_out].set(params["dec_w"])
              .at[Ct, :n_out].set(params["dec_b"]))

    return {
        "g": g_p.astype(jnp.bfloat16),
        "bconv": bconv_p,
        "wdec": wdec_p.astype(jnp.bfloat16),
        "seq_len": L,
        "n_out": int(n_out),
        "vocab": int(V),
    }


# ---------------------------------------------------------------------------
# Forward pass (only XLA glue left: tiny int32 batch pad + final slice)
# ---------------------------------------------------------------------------
def cnn_rand_forward(fused, inputs):
    B, L = inputs.shape
    assert L == fused["seq_len"], "fused weights were folded for a different L"

    tm = _choose_tm(B)
    n_tiles = pl.cdiv(B, tm)
    bp = n_tiles * tm

    ids = inputs.astype(jnp.int32)
    if bp != B:
        ids = jnp.pad(ids, ((0, bp - B), (0, 0)))   # padded rows -> garbage logits,
                                                    # sliced off below (never reduced)
    out = _fused_pallas_call(ids, fused["g"], fused["bconv"], fused["wdec"], tm)
    return out[:B, :fused["n_out"]]


# ---------------------------------------------------------------------------
# Pure-JAX f32 reference mirroring the PyTorch module (for correctness check)
# ---------------------------------------------------------------------------
def reference(params, inputs):
    emb = params["embedding"][inputs]                         # (B, L, E)
    x = jnp.transpose(emb, (0, 2, 1))                         # (B, E, L)
    feats = []
    for w, b in zip(params["conv_w"], params["conv_b"]):
        C, E, k = w.shape
        L = x.shape[-1]
        lout = L - k + 1
        conv = jnp.stack(
            [jnp.einsum("bek,cek->bc", x[:, :, t:t + k], w) for t in range(lout)],
            axis=-1) + b[None, :, None]                       # (B, C, Lout)
        feats.append(jnp.maximum(conv.mean(axis=-1), 0.0))    # relu(avgpool(conv))
    enc = jnp.concatenate(feats, axis=1)                      # dropout = identity (eval)
    return enc @ params["dec_w"] + params["dec_b"]


# ---------------------------------------------------------------------------
# Deterministic parameter init (shapes from CNN_randModel.__init__)
# ---------------------------------------------------------------------------
def init_params(key, vocab_size, embed_size, kernel_sizes, num_channels):
    n = len(kernel_sizes)
    keys = jax.random.split(key, 2 * n + 3)
    params = {
        "embedding": jax.random.normal(keys[0], (vocab_size, embed_size), jnp.float32),
        "conv_w": [],
        "conv_b": [],
    }
    for i, (c, k) in enumerate(zip(num_channels, kernel_sizes)):
        params["conv_w"].append(
            0.1 * jax.random.normal(keys[1 + 2 * i], (c, embed_size, k), jnp.float32))
        params["conv_b"].append(
            0.1 * jax.random.normal(keys[2 + 2 * i], (c,), jnp.float32))
    D = sum(num_channels)
    params["dec_w"] = 0.2 * jax.random.normal(keys[2 * n + 1], (D, 2), jnp.float32)
    params["dec_b"] = 0.1 * jax.random.normal(keys[2 * n + 2], (2,), jnp.float32)
    return params


if __name__ == "__main__":
    vocab_size, embed_size = 50, 32
    kernel_sizes = [3, 4, 5]
    num_channels = [8, 8, 8]
    B, L = 2, 16

    key = jax.random.PRNGKey(0)
    pkey, ikey = jax.random.split(key)
    params = init_params(pkey, vocab_size, embed_size, kernel_sizes, num_channels)
    inputs = jax.random.randint(ikey, (B, L), 0, vocab_size, dtype=jnp.int32)

    fused = prepare_fused_params(params, seq_len=L)           # one-time folding
    out = jax.block_until_ready(cnn_rand_forward(fused, inputs))
    assert out.shape == (B, 2)

    # Tolerance accounts for bf16 folded weights (f32 MXU accumulation).
    ref = reference(params, inputs)
    np.testing.assert_allclose(np.asarray(out), np.asarray(ref), rtol=2e-2, atol=2e-2)
    print("KERNEL_OK")
</pallas_src>

<mosaic_0001>
module attributes {stable_mosaic.version = 11 : i64} {
  func.func @_fused_textcnn_kernel(%arg0: i32, %arg1: memref<16x16xi32, #tpu.memory_space<vmem>>, %arg2: memref<16x128x128xbf16, #tpu.memory_space<vmem>>, %arg3: memref<1x128xf32, #tpu.memory_space<vmem>>, %arg4: memref<128x128xbf16, #tpu.memory_space<vmem>>, %arg5: memref<16x128xf32, #tpu.memory_space<vmem>>) attributes {dimension_semantics = [#tpu.dimension_semantics<parallel>], iteration_bounds = array<i64: 1>, scalar_prefetch = 0 : i64, scratch_operands = 0 : i64, tpu.core_type = #tpu.core_type<tc>, window_params = [{transform_indices = @transform_0, window_bounds = array<i64: 16, 16>}, {pipeline_mode = #tpu.pipeline_mode<synchronous>, transform_indices = @transform_1, window_bounds = array<i64: 16, 128, 128>}, {pipeline_mode = #tpu.pipeline_mode<synchronous>, transform_indices = @transform_2, window_bounds = array<i64: 1, 128>}, {pipeline_mode = #tpu.pipeline_mode<synchronous>, transform_indices = @transform_3, window_bounds = array<i64: 128, 128>}, {transform_indices = @transform_4, window_bounds = array<i64: 16, 128>}]} {
    %c0 = arith.constant 0 : index
    %c0_0 = arith.constant 0 : index
    %0 = vector.load %arg1[%c0, %c0_0] : memref<16x16xi32, #tpu.memory_space<vmem>>, vector<16x16xi32>
    %1 = tpu.iota {dimensions = array<i32: 1>} : vector<16x128xi32>
    %cst = arith.constant 0.000000e+00 : f32
    %2 = vector.broadcast %cst : f32 to vector<16x128xf32>
    %3 = vector.extract_strided_slice %0 {offsets = [0, 0], sizes = [16, 1], strides = [1, 1]} : vector<16x16xi32> to vector<16x1xi32>
    %4 = vector.broadcast %3 : vector<16x1xi32> to vector<16x128xi32>
    %5 = arith.cmpi eq, %1, %4 : vector<16x128xi32>
    %cst_1 = arith.constant 1.000000e+00 : f32
    %cst_2 = arith.constant 0.000000e+00 : f32
    %6 = vector.broadcast %cst_1 : f32 to vector<16x128xf32>
    %7 = vector.broadcast %cst_2 : f32 to vector<16x128xf32>
    %8 = arith.select %5, %6, %7 : vector<16x128xi1>, vector<16x128xf32>
    %9 = arith.truncf %8 : vector<16x128xf32> to vector<16x128xbf16>
    %c0_3 = arith.constant 0 : index
    %c0_4 = arith.constant 0 : index
    %c0_5 = arith.constant 0 : index
    %10 = vector.load %arg2[%c0_3, %c0_4, %c0_5] : memref<16x128x128xbf16, #tpu.memory_space<vmem>>, vector<1x128x128xbf16>
    %11 = vector.shape_cast %10 : vector<1x128x128xbf16> to vector<128x128xbf16>
    %cst_6 = arith.constant dense<0.000000e+00> : vector<16x128xf32>
    %12 = tpu.matmul %9, %11, %cst_6 {dimension_numbers = #tpu.dot_dimension_numbers<[1], [0], [0], [1], [0, 0, 1, 1], [], []>} : vector<16x128xbf16>, vector<128x128xbf16>, vector<16x128xf32> -> vector<16x128xf32>
    %13 = arith.addf %2, %12 : vector<16x128xf32>
    %14 = vector.extract_strided_slice %0 {offsets = [0, 1], sizes = [16, 1], strides = [1, 1]} : vector<16x16xi32> to vector<16x1xi32>
    %15 = vector.broadcast %14 : vector<16x1xi32> to vector<16x128xi32>
    %16 = arith.cmpi eq, %1, %15 : vector<16x128xi32>
    %cst_7 = arith.constant 1.000000e+00 : f32
    %cst_8 = arith.constant 0.000000e+00 : f32
    %17 = vector.broadcast %cst_7 : f32 to vector<16x128xf32>
    %18 = vector.broadcast %cst_8 : f32 to vector<16x128xf32>
    %19 = arith.select %16, %17, %18 : vector<16x128xi1>, vector<16x128xf32>
    %20 = arith.truncf %19 : vector<16x128xf32> to vector<16x128xbf16>
    %c1 = arith.constant 1 : index
    %c0_9 = arith.constant 0 : index
    %c0_10 = arith.constant 0 : index
    %21 = vector.load %arg2[%c1, %c0_9, %c0_10] : memref<16x128x128xbf16, #tpu.memory_space<vmem>>, vector<1x128x128xbf16>
    %22 = vector.shape_cast %21 : vector<1x128x128xbf16> to vector<128x128xbf16>
    %cst_11 = arith.constant dense<0.000000e+00> : vector<16x128xf32>
    %23 = tpu.matmul %20, %22, %cst_11 {dimension_numbers = #tpu.dot_dimension_numbers<[1], [0], [0], [1], [0, 0, 1, 1], [], []>} : vector<16x128xbf16>, vector<128x128xbf16>, vector<16x128xf32> -> vector<16x128xf32>
    %24 = arith.addf %13, %23 : vector<16x128xf32>
    %25 = vector.extract_strided_slice %0 {offsets = [0, 2], sizes = [16, 1], strides = [1, 1]} : vector<16x16xi32> to vector<16x1xi32>
    %26 = vector.broadcast %25 : vector<16x1xi32> to vector<16x128xi32>
    %27 = arith.cmpi eq, %1, %26 : vector<16x128xi32>
    %cst_12 = arith.constant 1.000000e+00 : f32
    %cst_13 = arith.constant 0.000000e+00 : f32
    %28 = vector.broadcast %cst_12 : f32 to vector<16x128xf32>
    %29 = vector.broadcast %cst_13 : f32 to vector<16x128xf32>
    %30 = arith.select %27, %28, %29 : vector<16x128xi1>, vector<16x128xf32>
    %31 = arith.truncf %30 : vector<16x128xf32> to vector<16x128xbf16>
    %c2 = arith.constant 2 : index
    %c0_14 = arith.constant 0 : index
    %c0_15 = arith.constant 0 : index
    %32 = vector.load %arg2[%c2, %c0_14, %c0_15] : memref<16x128x128xbf16, #tpu.memory_space<vmem>>, vector<1x128x128xbf16>
    %33 = vector.shape_cast %32 : vector<1x128x128xbf16> to vector<128x128xbf16>
    %cst_16 = arith.constant dense<0.000000e+00> : vector<16x128xf32>
    %34 = tpu.matmul %31, %33, %cst_16 {dimension_numbers = #tpu.dot_dimension_numbers<[1], [0], [0], [1], [0, 0, 1, 1], [], []>} : vector<16x128xbf16>, vector<128x128xbf16>, vector<16x128xf32> -> vector<16x128xf32>
    %35 = arith.addf %24, %34 : vector<16x128xf32>
    %36 = vector.extract_strided_slice %0 {offsets = [0, 3], sizes = [16, 1], strides = [1, 1]} : vector<16x16xi32> to vector<16x1xi32>
    %37 = vector.broadcast %36 : vector<16x1xi32> to vector<16x128xi32>
    %38 = arith.cmpi eq, %1, %37 : vector<16x128xi32>
    %cst_17 = arith.constant 1.000000e+00 : f32
    %cst_18 = arith.constant 0.000000e+00 : f32
    %39 = vector.broadcast %cst_17 : f32 to vector<16x128xf32>
    %40 = vector.broadcast %cst_18 : f32 to vector<16x128xf32>
    %41 = arith.select %38, %39, %40 : vector<16x128xi1>, vector<16x128xf32>
    %42 = arith.truncf %41 : vector<16x128xf32> to vector<16x128xbf16>
    %c3 = arith.constant 3 : index
    %c0_19 = arith.constant 0 : index
    %c0_20 = arith.constant 0 : index
    %43 = vector.load %arg2[%c3, %c0_19, %c0_20] : memref<16x128x128xbf16, #tpu.memory_space<vmem>>, vector<1x128x128xbf16>
    %44 = vector.shape_cast %43 : vector<1x128x128xbf16> to vector<128x128xbf16>
    %cst_21 = arith.constant dense<0.000000e+00> : vector<16x128xf32>
    %45 = tpu.matmul %42, %44, %cst_21 {dimension_numbers = #tpu.dot_dimension_numbers<[1], [0], [0], [1], [0, 0, 1, 1], [], []>} : vector<16x128xbf16>, vector<128x128xbf16>, vector<16x128xf32> -> vector<16x128xf32>
    %46 = arith.addf %35, %45 : vector<16x128xf32>
    %47 = vector.extract_strided_slice %0 {offsets = [0, 4], sizes = [16, 1], strides = [1, 1]} : vector<16x16xi32> to vector<16x1xi32>
    %48 = vector.broadcast %47 : vector<16x1xi32> to vector<16x128xi32>
    %49 = arith.cmpi eq, %1, %48 : vector<16x128xi32>
    %cst_22 = arith.constant 1.000000e+00 : f32
    %cst_23 = arith.constant 0.000000e+00 : f32
    %50 = vector.broadcast %cst_22 : f32 to vector<16x128xf32>
    %51 = vector.broadcast %cst_23 : f32 to vector<16x128xf32>
    %52 = arith.select %49, %50, %51 : vector<16x128xi1>, vector<16x128xf32>
    %53 = arith.truncf %52 : vector<16x128xf32> to vector<16x128xbf16>
    %c4 = arith.constant 4 : index
    %c0_24 = arith.constant 0 : index
    %c0_25 = arith.constant 0 : index
    %54 = vector.load %arg2[%c4, %c0_24, %c0_25] : memref<16x128x128xbf16, #tpu.memory_space<vmem>>, vector<1x128x128xbf16>
    %55 = vector.shape_cast %54 : vector<1x128x128xbf16> to vector<128x128xbf16>
    %cst_26 = arith.constant dense<0.000000e+00> : vector<16x128xf32>
    %56 = tpu.matmul %53, %55, %cst_26 {dimension_numbers = #tpu.dot_dimension_numbers<[1], [0], [0], [1], [0, 0, 1, 1], [], []>} : vector<16x128xbf16>, vector<128x128xbf16>, vector<16x128xf32> -> vector<16x128xf32>
    %57 = arith.addf %46, %56 : vector<16x128xf32>
    %58 = vector.extract_strided_slice %0 {offsets = [0, 5], sizes = [16, 1], strides = [1, 1]} : vector<16x16xi32> to vector<16x1xi32>
    %59 = vector.broadcast %58 : vector<16x1xi32> to vector<16x128xi32>
    %60 = arith.cmpi eq, %1, %59 : vector<16x128xi32>
    %cst_27 = arith.constant 1.000000e+00 : f32
    %cst_28 = arith.constant 0.000000e+00 : f32
    %61 = vector.broadcast %cst_27 : f32 to vector<16x128xf32>
    %62 = vector.broadcast %cst_28 : f32 to vector<16x128xf32>
    %63 = arith.select %60, %61, %62 : vector<16x128xi1>, vector<16x128xf32>
    %64 = arith.truncf %63 : vector<16x128xf32> to vector<16x128xbf16>
    %c5 = arith.constant 5 : index
    %c0_29 = arith.constant 0 : index
    %c0_30 = arith.constant 0 : index
    %65 = vector.load %arg2[%c5, %c0_29, %c0_30] : memref<16x128x128xbf16, #tpu.memory_space<vmem>>, vector<1x128x128xbf16>
    %66 = vector.shape_cast %65 : vector<1x128x128xbf16> to vector<128x128xbf16>
    %cst_31 = arith.constant dense<0.000000e+00> : vector<16x128xf32>
    %67 = tpu.matmul %64, %66, %cst_31 {dimension_numbers = #tpu.dot_dimension_numbers<[1], [0], [0], [1], [0, 0, 1, 1], [], []>} : vector<16x128xbf16>, vector<128x128xbf16>, vector<16x128xf32> -> vector<16x128xf32>
    %68 = arith.addf %57, %67 : vector<16x128xf32>
    %69 = vector.extract_strided_slice %0 {offsets = [0, 6], sizes = [16, 1], strides = [1, 1]} : vector<16x16xi32> to vector<16x1xi32>
    %70 = vector.broadcast %69 : vector<16x1xi32> to vector<16x128xi32>
    %71 = arith.cmpi eq, %1, %70 : vector<16x128xi32>
    %cst_32 = arith.constant 1.000000e+00 : f32
    %cst_33 = arith.constant 0.000000e+00 : f32
    %72 = vector.broadcast %cst_32 : f32 to vector<16x128xf32>
    %73 = vector.broadcast %cst_33 : f32 to vector<16x128xf32>
    %74 = arith.select %71, %72, %73 : vector<16x128xi1>, vector<16x128xf32>
    %75 = arith.truncf %74 : vector<16x128xf32> to vector<16x128xbf16>
    %c6 = arith.constant 6 : index
    %c0_34 = arith.constant 0 : index
    %c0_35 = arith.constant 0 : index
    %76 = vector.load %arg2[%c6, %c0_34, %c0_35] : memref<16x128x128xbf16, #tpu.memory_space<vmem>>, vector<1x128x128xbf16>
    %77 = vector.shape_cast %76 : vector<1x128x128xbf16> to vector<128x128xbf16>
    %cst_36 = arith.constant dense<0.000000e+00> : vector<16x128xf32>
    %78 = tpu.matmul %75, %77, %cst_36 {dimension_numbers = #tpu.dot_dimension_numbers<[1], [0], [0], [1], [0, 0, 1, 1], [], []>} : vector<16x128xbf16>, vector<128x128xbf16>, vector<16x128xf32> -> vector<16x128xf32>
    %79 = arith.addf %68, %78 : vector<16x128xf32>
    %80 = vector.extract_strided_slice %0 {offsets = [0, 7], sizes = [16, 1], strides = [1, 1]} : vector<16x16xi32> to vector<16x1xi32>
    %81 = vector.broadcast %80 : vector<16x1xi32> to vector<16x128xi32>
    %82 = arith.cmpi eq, %1, %81 : vector<16x128xi32>
    %cst_37 = arith.constant 1.000000e+00 : f32
    %cst_38 = arith.constant 0.000000e+00 : f32
    %83 = vector.broadcast %cst_37 : f32 to vector<16x128xf32>
    %84 = vector.broadcast %cst_38 : f32 to vector<16x128xf32>
    %85 = arith.select %82, %83, %84 : vector<16x128xi1>, vector<16x128xf32>
    %86 = arith.truncf %85 : vector<16x128xf32> to vector<16x128xbf16>
    %c7 = arith.constant 7 : index
    %c0_39 = arith.constant 0 : index
    %c0_40 = arith.constant 0 : index
    %87 = vector.load %arg2[%c7, %c0_39, %c0_40] : memref<16x128x128xbf16, #tpu.memory_space<vmem>>, vector<1x128x128xbf16>
    %88 = vector.shape_cast %87 : vector<1x128x128xbf16> to vector<128x128xbf16>
    %cst_41 = arith.constant dense<0.000000e+00> : vector<16x128xf32>
    %89 = tpu.matmul %86, %88, %cst_41 {dimension_numbers = #tpu.dot_dimension_numbers<[1], [0], [0], [1], [0, 0, 1, 1], [], []>} : vector<16x128xbf16>, vector<128x128xbf16>, vector<16x128xf32> -> vector<16x128xf32>
    %90 = arith.addf %79, %89 : vector<16x128xf32>
    %91 = vector.extract_strided_slice %0 {offsets = [0, 8], sizes = [16, 1], strides = [1, 1]} : vector<16x16xi32> to vector<16x1xi32>
    %92 = vector.broadcast %91 : vector<16x1xi32> to vector<16x128xi32>
    %93 = arith.cmpi eq, %1, %92 : vector<16x128xi32>
    %cst_42 = arith.constant 1.000000e+00 : f32
    %cst_43 = arith.constant 0.000000e+00 : f32
    %94 = vector.broadcast %cst_42 : f32 to vector<16x128xf32>
    %95 = vector.broadcast %cst_43 : f32 to vector<16x128xf32>
    %96 = arith.select %93, %94, %95 : vector<16x128xi1>, vector<16x128xf32>
    %97 = arith.truncf %96 : vector<16x128xf32> to vector<16x128xbf16>
    %c8 = arith.constant 8 : index
    %c0_44 = arith.constant 0 : index
    %c0_45 = arith.constant 0 : index
    %98 = vector.load %arg2[%c8, %c0_44, %c0_45] : memref<16x128x128xbf16, #tpu.memory_space<vmem>>, vector<1x128x128xbf16>
    %99 = vector.shape_cast %98 : vector<1x128x128xbf16> to vector<128x128xbf16>
    %cst_46 = arith.constant dense<0.000000e+00> : vector<16x128xf32>
    %100 = tpu.matmul %97, %99, %cst_46 {dimension_numbers = #tpu.dot_dimension_numbers<[1], [0], [0], [1], [0, 0, 1, 1], [], []>} : vector<16x128xbf16>, vector<128x128xbf16>, vector<16x128xf32> -> vector<16x128xf32>
    %101 = arith.addf %90, %100 : vector<16x128xf32>
    %102 = vector.extract_strided_slice %0 {offsets = [0, 9], sizes = [16, 1], strides = [1, 1]} : vector<16x16xi32> to vector<16x1xi32>
    %103 = vector.broadcast %102 : vector<16x1xi32> to vector<16x128xi32>
    %104 = arith.cmpi eq, %1, %103 : vector<16x128xi32>
    %cst_47 = arith.constant 1.000000e+00 : f32
    %cst_48 = arith.constant 0.000000e+00 : f32
    %105 = vector.broadcast %cst_47 : f32 to vector<16x128xf32>
    %106 = vector.broadcast %cst_48 : f32 to vector<16x128xf32>
    %107 = arith.select %104, %105, %106 : vector<16x128xi1>, vector<16x128xf32>
    %108 = arith.truncf %107 : vector<16x128xf32> to vector<16x128xbf16>
    %c9 = arith.constant 9 : index
    %c0_49 = arith.constant 0 : index
    %c0_50 = arith.constant 0 : index
    %109 = vector.load %arg2[%c9, %c0_49, %c0_50] : memref<16x128x128xbf16, #tpu.memory_space<vmem>>, vector<1x128x128xbf16>
    %110 = vector.shape_cast %109 : vector<1x128x128xbf16> to vector<128x128xbf16>
    %cst_51 = arith.constant dense<0.000000e+00> : vector<16x128xf32>
    %111 = tpu.matmul %108, %110, %cst_51 {dimension_numbers = #tpu.dot_dimension_numbers<[1], [0], [0], [1], [0, 0, 1, 1], [], []>} : vector<16x128xbf16>, vector<128x128xbf16>, vector<16x128xf32> -> vector<16x128xf32>
    %112 = arith.addf %101, %111 : vector<16x128xf32>
    %113 = vector.extract_strided_slice %0 {offsets = [0, 10], sizes = [16, 1], strides = [1, 1]} : vector<16x16xi32> to vector<16x1xi32>
    %114 = vector.broadcast %113 : vector<16x1xi32> to vector<16x128xi32>
    %115 = arith.cmpi eq, %1, %114 : vector<16x128xi32>
    %cst_52 = arith.constant 1.000000e+00 : f32
    %cst_53 = arith.constant 0.000000e+00 : f32
    %116 = vector.broadcast %cst_52 : f32 to vector<16x128xf32>
    %117 = vector.broadcast %cst_53 : f32 to vector<16x128xf32>
    %118 = arith.select %115, %116, %117 : vector<16x128xi1>, vector<16x128xf32>
    %119 = arith.truncf %118 : vector<16x128xf32> to vector<16x128xbf16>
    %c10 = arith.constant 10 : index
    %c0_54 = arith.constant 0 : index
    %c0_55 = arith.constant 0 : index
    %120 = vector.load %arg2[%c10, %c0_54, %c0_55] : memref<16x128x128xbf16, #tpu.memory_space<vmem>>, vector<1x128x128xbf16>
    %121 = vector.shape_cast %120 : vector<1x128x128xbf16> to vector<128x128xbf16>
    %cst_56 = arith.constant dense<0.000000e+00> : vector<16x128xf32>
    %122 = tpu.matmul %119, %121, %cst_56 {dimension_numbers = #tpu.dot_dimension_numbers<[1], [0], [0], [1], [0, 0, 1, 1], [], []>} : vector<16x128xbf16>, vector<128x128xbf16>, vector<16x128xf32> -> vector<16x128xf32>
    %123 = arith.addf %112, %122 : vector<16x128xf32>
    %124 = vector.extract_strided_slice %0 {offsets = [0, 11], sizes = [16, 1], strides = [1, 1]} : vector<16x16xi32> to vector<16x1xi32>
    %125 = vector.broadcast %124 : vector<16x1xi32> to vector<16x128xi32>
    %126 = arith.cmpi eq, %1, %125 : vector<16x128xi32>
    %cst_57 = arith.constant 1.000000e+00 : f32
    %cst_58 = arith.constant 0.000000e+00 : f32
    %127 = vector.broadcast %cst_57 : f32 to vector<16x128xf32>
    %128 = vector.broadcast %cst_58 : f32 to vector<16x128xf32>
    %129 = arith.select %126, %127, %128 : vector<16x128xi1>, vector<16x128xf32>
    %130 = arith.truncf %129 : vector<16x128xf32> to vector<16x128xbf16>
    %c11 = arith.constant 11 : index
    %c0_59 = arith.constant 0 : index
    %c0_60 = arith.constant 0 : index
    %131 = vector.load %arg2[%c11, %c0_59, %c0_60] : memref<16x128x128xbf16, #tpu.memory_space<vmem>>, vector<1x128x128xbf16>
    %132 = vector.shape_cast %131 : vector<1x128x128xbf16> to vector<128x128xbf16>
    %cst_61 = arith.constant dense<0.000000e+00> : vector<16x128xf32>
    %133 = tpu.matmul %130, %132, %cst_61 {dimension_numbers = #tpu.dot_dimension_numbers<[1], [0], [0], [1], [0, 0, 1, 1], [], []>} : vector<16x128xbf16>, vector<128x128xbf16>, vector<16x128xf32> -> vector<16x128xf32>
    %134 = arith.addf %123, %133 : vector<16x128xf32>
    %135 = vector.extract_strided_slice %0 {offsets = [0, 12], sizes = [16, 1], strides = [1, 1]} : vector<16x16xi32> to vector<16x1xi32>
    %136 = vector.broadcast %135 : vector<16x1xi32> to vector<16x128xi32>
    %137 = arith.cmpi eq, %1, %136 : vector<16x128xi32>
    %cst_62 = arith.constant 1.000000e+00 : f32
    %cst_63 = arith.constant 0.000000e+00 : f32
    %138 = vector.broadcast %cst_62 : f32 to vector<16x128xf32>
    %139 = vector.broadcast %cst_63 : f32 to vector<16x128xf32>
    %140 = arith.select %137, %138, %139 : vector<16x128xi1>, vector<16x128xf32>
    %141 = arith.truncf %140 : vector<16x128xf32> to vector<16x128xbf16>
    %c12 = arith.constant 12 : index
    %c0_64 = arith.constant 0 : index
    %c0_65 = arith.constant 0 : index
    %142 = vector.load %arg2[%c12, %c0_64, %c0_65] : memref<16x128x128xbf16, #tpu.memory_space<vmem>>, vector<1x128x128xbf16>
    %143 = vector.shape_cast %142 : vector<1x128x128xbf16> to vector<128x128xbf16>
    %cst_66 = arith.constant dense<0.000000e+00> : vector<16x128xf32>
    %144 = tpu.matmul %141, %143, %cst_66 {dimension_numbers = #tpu.dot_dimension_numbers<[1], [0], [0], [1], [0, 0, 1, 1], [], []>} : vector<16x128xbf16>, vector<128x128xbf16>, vector<16x128xf32> -> vector<16x128xf32>
    %145 = arith.addf %134, %144 : vector<16x128xf32>
    %146 = vector.extract_strided_slice %0 {offsets = [0, 13], sizes = [16, 1], strides = [1, 1]} : vector<16x16xi32> to vector<16x1xi32>
    %147 = vector.broadcast %146 : vector<16x1xi32> to vector<16x128xi32>
    %148 = arith.cmpi eq, %1, %147 : vector<16x128xi32>
    %cst_67 = arith.constant 1.000000e+00 : f32
    %cst_68 = arith.constant 0.000000e+00 : f32
    %149 = vector.broadcast %cst_67 : f32 to vector<16x128xf32>
    %150 = vector.broadcast %cst_68 : f32 to vector<16x128xf32>
    %151 = arith.select %148, %149, %150 : vector<16x128xi1>, vector<16x128xf32>
    %152 = arith.truncf %151 : vector<16x128xf32> to vector<16x128xbf16>
    %c13 = arith.constant 13 : index
    %c0_69 = arith.constant 0 : index
    %c0_70 = arith.constant 0 : index
    %153 = vector.load %arg2[%c13, %c0_69, %c0_70] : memref<16x128x128xbf16, #tpu.memory_space<vmem>>, vector<1x128x128xbf16>
    %154 = vector.shape_cast %153 : vector<1x128x128xbf16> to vector<128x128xbf16>
    %cst_71 = arith.constant dense<0.000000e+00> : vector<16x128xf32>
    %155 = tpu.matmul %152, %154, %cst_71 {dimension_numbers = #tpu.dot_dimension_numbers<[1], [0], [0], [1], [0, 0, 1, 1], [], []>} : vector<16x128xbf16>, vector<128x128xbf16>, vector<16x128xf32> -> vector<16x128xf32>
    %156 = arith.addf %145, %155 : vector<16x128xf32>
    %157 = vector.extract_strided_slice %0 {offsets = [0, 14], sizes = [16, 1], strides = [1, 1]} : vector<16x16xi32> to vector<16x1xi32>
    %158 = vector.broadcast %157 : vector<16x1xi32> to vector<16x128xi32>
    %159 = arith.cmpi eq, %1, %158 : vector<16x128xi32>
    %cst_72 = arith.constant 1.000000e+00 : f32
    %cst_73 = arith.constant 0.000000e+00 : f32
    %160 = vector.broadcast %cst_72 : f32 to vector<16x128xf32>
    %161 = vector.broadcast %cst_73 : f32 to vector<16x128xf32>
    %162 = arith.select %159, %160, %161 : vector<16x128xi1>, vector<16x128xf32>
    %163 = arith.truncf %162 : vector<16x128xf32> to vector<16x128xbf16>
    %c14 = arith.constant 14 : index
    %c0_74 = arith.constant 0 : index
    %c0_75 = arith.constant 0 : index
    %164 = vector.load %arg2[%c14, %c0_74, %c0_75] : memref<16x128x128xbf16, #tpu.memory_space<vmem>>, vector<1x128x128xbf16>
    %165 = vector.shape_cast %164 : vector<1x128x128xbf16> to vector<128x128xbf16>
    %cst_76 = arith.constant dense<0.000000e+00> : vector<16x128xf32>
    %166 = tpu.matmul %163, %165, %cst_76 {dimension_numbers = #tpu.dot_dimension_numbers<[1], [0], [0], [1], [0, 0, 1, 1], [], []>} : vector<16x128xbf16>, vector<128x128xbf16>, vector<16x128xf32> -> vector<16x128xf32>
    %167 = arith.addf %156, %166 : vector<16x128xf32>
    %168 = vector.extract_strided_slice %0 {offsets = [0, 15], sizes = [16, 1], strides = [1, 1]} : vector<16x16xi32> to vector<16x1xi32>
    %169 = vector.broadcast %168 : vector<16x1xi32> to vector<16x128xi32>
    %170 = arith.cmpi eq, %1, %169 : vector<16x128xi32>
    %cst_77 = arith.constant 1.000000e+00 : f32
    %cst_78 = arith.constant 0.000000e+00 : f32
    %171 = vector.broadcast %cst_77 : f32 to vector<16x128xf32>
    %172 = vector.broadcast %cst_78 : f32 to vector<16x128xf32>
    %173 = arith.select %170, %171, %172 : vector<16x128xi1>, vector<16x128xf32>
    %174 = arith.truncf %173 : vector<16x128xf32> to vector<16x128xbf16>
    %c15 = arith.constant 15 : index
    %c0_79 = arith.constant 0 : index
    %c0_80 = arith.constant 0 : index
    %175 = vector.load %arg2[%c15, %c0_79, %c0_80] : memref<16x128x128xbf16, #tpu.memory_space<vmem>>, vector<1x128x128xbf16>
    %176 = vector.shape_cast %175 : vector<1x128x128xbf16> to vector<128x128xbf16>
    %cst_81 = arith.constant dense<0.000000e+00> : vector<16x128xf32>
    %177 = tpu.matmul %174, %176, %cst_81 {dimension_numbers = #tpu.dot_dimension_numbers<[1], [0], [0], [1], [0, 0, 1, 1], [], []>} : vector<16x128xbf16>, vector<128x128xbf16>, vector<16x128xf32> -> vector<16x128xf32>
    %178 = arith.addf %167, %177 : vector<16x128xf32>
    %c0_82 = arith.constant 0 : index
    %c0_83 = arith.constant 0 : index
    %179 = vector.load %arg3[%c0_82, %c0_83] : memref<1x128xf32, #tpu.memory_space<vmem>>, vector<1x128xf32>
    %180 = vector.broadcast %179 : vector<1x128xf32> to vector<16x128xf32>
    %181 = arith.addf %178, %180 : vector<16x128xf32>
    %cst_84 = arith.constant 0.000000e+00 : f32
    %182 = vector.broadcast %cst_84 : f32 to vector<16x128xf32>
    %183 = arith.maximumf %181, %182 : vector<16x128xf32>
    %184 = arith.truncf %183 : vector<16x128xf32> to vector<16x128xbf16>
    %c0_85 = arith.constant 0 : index
    %c0_86 = arith.constant 0 : index
    %185 = vector.load %arg4[%c0_85, %c0_86] : memref<128x128xbf16, #tpu.memory_space<vmem>>, vector<128x128xbf16>
    %cst_87 = arith.constant dense<0.000000e+00> : vector<16x128xf32>
    %186 = tpu.matmul %184, %185, %cst_87 {dimension_numbers = #tpu.dot_dimension_numbers<[1], [0], [0], [1], [0, 0, 1, 1], [], []>} : vector<16x128xbf16>, vector<128x128xbf16>, vector<16x128xf32> -> vector<16x128xf32>
    %c0_88 = arith.constant 0 : index
    %c0_89 = arith.constant 0 : index
    %187 = vector.load %arg5[%c0_88, %c0_89] : memref<16x128xf32, #tpu.memory_space<vmem>>, vector<16x128xf32>
    tpu.vector_store %arg5[%c0_88, %c0_89], %186 {strides = array<i32>} : memref<16x128xf32, #tpu.memory_space<vmem>>, vector<16x128xf32>,
    return
  }
  func.func @transform_0(%arg0: i32) -> (i32, i32) {
    %c0_i32 = arith.constant 0 : i32
    %c0_i32_0 = arith.constant 0 : i32
    return %arg0, %c0_i32 : i32, i32
  }
  func.func @transform_1(%arg0: i32) -> (i32, i32, i32) {
    %c0_i32 = arith.constant 0 : i32
    %c0_i32_0 = arith.constant 0 : i32
    %c0_i32_1 = arith.constant 0 : i32
    %c0_i32_2 = arith.constant 0 : i32
    return %c0_i32, %c0_i32_0, %c0_i32_1 : i32, i32, i32
  }
  func.func @transform_2(%arg0: i32) -> (i32, i32) {
    %c0_i32 = arith.constant 0 : i32
    %c0_i32_0 = arith.constant 0 : i32
    %c0_i32_1 = arith.constant 0 : i32
    return %c0_i32, %c0_i32_0 : i32, i32
  }
  func.func @transform_3(%arg0: i32) -> (i32, i32) {
    %c0_i32 = arith.constant 0 : i32
    %c0_i32_0 = arith.constant 0 : i32
    %c0_i32_1 = arith.constant 0 : i32
    return %c0_i32, %c0_i32_0 : i32, i32
  }
  func.func @transform_4(%arg0: i32) -> (i32, i32) {
    %c0_i32 = arith.constant 0 : i32
    %c0_i32_0 = arith.constant 0 : i32
    return %arg0, %c0_i32 : i32, i32
  }
}

</mosaic_0001>

<bundles_post_ra>
// kernel: tpu_custom_call.1
= control target key start
LH: loop header
LB: loop body
LE: loop exit
PB: predicated region body
PF: predicated region fallthrough
CT: control target
= control target key end

     0   :  { %9 = vsyncpa [#allocation3], 0  ;;  %s3416_s0 = inlined_call_operand.hbm [shape: s32[16,16], index: 0, kind: input, shape index: {}]   ;;  %s3417_s1 = inlined_call_operand.hbm [shape: bf16[16,128,128], index: 1, kind: input, shape index: {}]   ;;  %s3418_s2 = inlined_call_operand.vmem [shape: f32[1,128], index: 2, kind: input, shape index: {}]   ;;  %s3419_s3 = inlined_call_operand.hbm [shape: bf16[128,128], index: 3, kind: input, shape index: {}]   ;;  %s3420_s4 = inlined_call_operand.hbm [shape: f32[16,128], index: 4, kind: output, shape index: {}]  }
   0x1   :  { %10 = vsyncpa [#allocation6], 0 }
   0x2   :  { %11 = vsyncpa [#allocation4], 0  ;;  %s3045_s15 = smov [#allocation5]   ;;  %s2951_s19 = scalar_lea.hbm %s3417_s1, 16384 }
   0x3   :  { %s29_s16 = sshll.u32 %s3045_s15, 4  ;;  %p2952_p0 = scmp.ne.s32.totalorder %s3417_s1, %s2951_s19  ;;  %s30_s16 = int_to_ptr.vmem [resolvable:$true] %s29_s16 }
   0x4   :  { %p2955_p1 = scmp.lt.u32.totalorder %s2951_s19, %s3417_s1 }
   0x6   :  { %p2957_p2 = pnand %p2955_p1, %p2952_p0 }
   0x8   :  { %2960 = shalt.err (!%p2957_p2)
}
   0x9   :  { %s2961_s24 = scalar_lea.vmem %s30_s16, 16384  ;;  %p2966_p4 = scmp.lt.s32.totalorder %s30_s16, %s30_s16 }
   0xa   :  { %p2962_p3 = scmp.ne.s32.totalorder %s30_s16, %s2961_s24  ;;  %p2967_p5 = scmp.lt.s32.totalorder %s2961_s24, %s2961_s24 }
   0xc   :  { %p2968_p6 = por %p2967_p5, %p2966_p4 }
   0xe   :  { %p2969_p7 = pnand %p2968_p6, %p2962_p3 }
  0x10   :  { %2972 = shalt.err (!%p2969_p7)
}
  0x11   :  { %s3046_s25 = smov 64   ;;  %s3047_s26 = smov 4  }
  0x12   :  { %35 = dma.hbm_to_vmem [thread:$0]  %s3417_s1, 16384, %s30_s16, [#allocation6], %s3046_s25, %s3046_s25, %s3047_s26  }
  0x13   :  { %s3048_s29 = smov [#allocation2]   ;;  %s2973_s7 = scalar_lea.hbm %s3416_s0, 256 }
  0x14   :  { %s17_s30 = sshll.u32 %s3048_s29, 4  ;;  %p2974_p8 = scmp.ne.s32.totalorder %s3416_s0, %s2973_s7  ;;  %s18_s30 = int_to_ptr.vmem [resolvable:$true] %s17_s30 }
  0x15   :  { %p2977_p9 = scmp.lt.u32.totalorder %s2973_s7, %s3416_s0 }
  0x17   :  { %p2979_p10 = pnand %p2977_p9, %p2974_p8 }
  0x19   :  { %2982 = shalt.err (!%p2979_p10)
}
  0x1a   :  { %s2983_s12 = scalar_lea.vmem %s18_s30, 256  ;;  %p2988_p12 = scmp.lt.s32.totalorder %s18_s30, %s18_s30 }
  0x1b   :  { %p2984_p11 = scmp.ne.s32.totalorder %s18_s30, %s2983_s12  ;;  %p2989_p13 = scmp.lt.s32.totalorder %s2983_s12, %s2983_s12 }
  0x1d   :  { %p2990_p0 = por %p2989_p13, %p2988_p12 }
  0x1f   :  { %p2991_p1 = pnand %p2990_p0, %p2984_p11 }
  0x21   :  { %2994 = shalt.err (!%p2991_p1)
}
  0x22   :  { %s3049_s1 = smov 128   ;;  %s3050_s13 = smov 8  }
  0x23   :  { %23 = dma.hbm_to_vmem [thread:$0]  %s3416_s0, 256, %s18_s30, [#allocation3], %s3049_s1, %s3049_s1, %s3050_s13  }
  0x24   :  { %s3051_s16 = smov [#allocation7]   ;;  %s2995_s20 = scalar_lea.hbm %s3419_s3, 1024 }
  0x25   :  { %s43_s17 = sshll.u32 %s3051_s16, 4  ;;  %p2996_p2 = scmp.ne.s32.totalorder %s3419_s3, %s2995_s20  ;;  %s44_s17 = int_to_ptr.vmem [resolvable:$true] %s43_s17 }
  0x26   :  { %p2999_p3 = scmp.lt.u32.totalorder %s2995_s20, %s3419_s3 }
  0x28   :  { %p3001_p4 = pnand %p2999_p3, %p2996_p2 }
  0x2a   :  { %3004 = shalt.err (!%p3001_p4)
}
  0x2b   :  { %s3005_s27 = scalar_lea.vmem %s44_s17, 1024  ;;  %p3010_p6 = scmp.lt.s32.totalorder %s44_s17, %s44_s17 }
  0x2c   :  { %p3006_p5 = scmp.ne.s32.totalorder %s44_s17, %s3005_s27  ;;  %p3011_p7 = scmp.lt.s32.totalorder %s3005_s27, %s3005_s27 }
  0x2e   :  { %p3012_p8 = por %p3011_p7, %p3010_p6 }
  0x30   :  { %p3013_p9 = pnand %p3012_p8, %p3006_p5 }
  0x32   :  { %3016 = shalt.err (!%p3013_p9)
}
  0x33   :  { %49 = dma.hbm_to_vmem [thread:$0]  %s3419_s3, 1024, %s44_s17, [#allocation6], %s3046_s25, %s3046_s25, %s3047_s26  }
  0x34   :  { %3039 = dma.done.wait [#allocation3], 256  }
  0x35   :  { %3040 = vsyncadd [#allocation3], 4294967040 }
  0x36   :  { %3041 = dma.done.wait [#allocation6], 17408  }
  0x37   :  { %3042 = vsyncadd [#allocation6], 4294949888  ;;  %v3052_v0 = vmov 1   ;;  %v3053_v1 = vmov 0   ;;  %v3054_v2 = vmov 0.0   ;;  %v3144_v3 = vld [vmem:[#allocation2] sm:$0xff]  ;;  %v62_v35 = vlaneseq }
  0x38   :  { %2789 = vset.pattern.permute.xlu0 %v3052_v0  ;;  %2790 = vset.pattern.permute.xlu1 %v3053_v1  ;;  %v3146_v4 = vld [vmem:[#allocation2 + $0x8] sm:$0xff]  ;;  %v2815_v5 = vld [vmem:[#allocation5 + $0x40] sm:$0xff]   ;;  %v2817_v7 = vld [vmem:[#allocation5 + $0x48] sm:$0xff]   ;;  %vm3055_vm0 = vmmov 0   ;;  %v3056_v11 = vmov 2   ;;  %v3057_v14 = vmov 3  }
  0x39   :  { %2422 = vmatprep.subr.bf16.mxu0 %v3054_v2  ;;  %2442 = vmatprep.subr.bf16.mxu1 %v3054_v2  ;;  %v2816_v6 = vld [vmem:[#allocation5] sm:$0xff]   ;;  %v2818_v8 = vld [vmem:[#allocation5 + $0x8] sm:$0xff]   ;;  %v2819_v9 = vld [vmem:[#allocation5 + $0x50] sm:$0xff]   ;;  %v3058_v17 = vmov 4   ;;  %v3059_v18 = vmov 5   ;;  %v3060_v21 = vmov 6  }
  0x3a   :  { %65 = vperm.xlu1 %2790, %v3144_v3   ;;  %92 = vperm.xlu0 %2789, %v3144_v3   ;;  %v2820_v10 = vld [vmem:[#allocation5 + $0x10] sm:$0xff]   ;;  %v2821_v12 = vld [vmem:[#allocation5 + $0x58] sm:$0xff]   ;;  %v2823_v15 = vld [vmem:[#allocation5 + $0x60] sm:$0xff]   ;;  %v3061_v24 = vmov 8   ;;  %v3062_v27 = vmov 9   ;;  %v3063_v28 = vmov 7  }
  0x3b   :  { %2423 = vmatpush3.bf16.msra.mxu0 %v2815_v5  ;;  %2443 = vmatpush3.bf16.msra.mxu1 %v2816_v6  ;;  %v2822_v13 = vld [vmem:[#allocation5 + $0x18] sm:$0xff]   ;;  %v2824_v16 = vld [vmem:[#allocation5 + $0x20] sm:$0xff]   ;;  %v2825_v19 = vld [vmem:[#allocation5 + $0x68] sm:$0xff]   ;;  %v3064_v29 = vmov 11   ;;  %v3065_v30 = vmov 10   ;;  %v3066_v31 = vmov 12  }
  0x3c   :  { %2424 = vmatprep.subr.bf16.mxu0 %v3054_v2  ;;  %2444 = vmatprep.subr.bf16.mxu1 %v3054_v2  ;;  %v2826_v20 = vld [vmem:[#allocation5 + $0x28] sm:$0xff]   ;;  %v2827_v22 = vld [vmem:[#allocation5 + $0x70] sm:$0xff]   ;;  %v2829_v25 = vld [vmem:[#allocation5 + $0x78] sm:$0xff]   ;;  %v3067_v32 = vmov 13   ;;  %v3068_v33 = vmov 14   ;;  %v3069_v34 = vmov 15  }
  0x3d   :  { %2438 = vmatprep.mubr.msk.bf16.mxu0 %vm3055_vm0, %v3054_v2  ;;  %2458 = vmatprep.mubr.msk.bf16.mxu1 %vm3055_vm0, %v3054_v2  ;;  %v2828_v23 = vld [vmem:[#allocation5 + $0x30] sm:$0xff]   ;;  %v2830_v26 = vld [vmem:[#allocation5 + $0x38] sm:$0xff]   ;;  %v3200_v38 = vand.u32 127, %v62_v35  ;;  %v2832_v41 = vld [vmem:[#allocation5 + $0xc0] sm:$0xff]   ;;  %v3070_v43 = vmov 1.0|1.0  }
  0x3e   :  { %68 = vperm.xlu1 %2790, %v3146_v4   ;;  %95 = vperm.xlu0 %2789, %v3146_v4   ;;  %v2831_v42 = vld [vmem:[#allocation5 + $0x80] sm:$0xff]   ;;  %v2834_v44 = vld [vmem:[#allocation5 + $0xc8] sm:$0xff]   ;;  %v2836_v46 = vld [vmem:[#allocation5 + $0xd0] sm:$0xff]   ;;  %s3071_s26 = smov [#allocation8]  }
  0x3f   :  { %2425 = vmatpush3.bf16.msra.mxu0 %v2817_v7  ;;  %2445 = vmatpush3.bf16.msra.mxu1 %v2818_v8  ;;  %v2833_v45 = vld [vmem:[#allocation5 + $0x88] sm:$0xff]   ;;  %v2835_v47 = vld [vmem:[#allocation5 + $0x90] sm:$0xff]   ;;  %v2838_v48 = vld [vmem:[#allocation5 + $0xd8] sm:$0xff]   ;;  %s2087_s29 = sshll.u32 %s3071_s26, 4  ;;  %s2088_s29 = int_to_ptr.vmem [resolvable:$true] %s2087_s29 }
  0x40   :  { %2426 = vmatprep.subr.bf16.mxu0 %v3054_v2  ;;  %2446 = vmatprep.subr.bf16.mxu1 %v3054_v2  ;;  %v2837_v49 = vld [vmem:[#allocation5 + $0x98] sm:$0xff]   ;;  %v2840_v50 = vld [vmem:[#allocation5 + $0xe0] sm:$0xff]   ;;  %v2842_v52 = vld [vmem:[#allocation5 + $0xe8] sm:$0xff]   ;;  %p3022_p11 = scmp.lt.s32.totalorder %s2088_s29, %s2088_s29 }
  0x41   :  { %v2839_v51 = vld [vmem:[#allocation5 + $0xa0] sm:$0xff]   ;;  %v2841_v55 = vld [vmem:[#allocation5 + $0xa8] sm:$0xff]   ;;  %v2843_v56 = vld [vmem:[#allocation5 + $0xf0] sm:$0xff]  }
  0x42   :  { %2792 = vset.pattern.permute.xlu1 %v3056_v11  ;;  %2791 = vset.pattern.permute.xlu0 %v3056_v11  ;;  %v2844_v57 = vld [vmem:[#allocation5 + $0xb0] sm:$0xff]   ;;  %v2845_v60 = vld [vmem:[#allocation5 + $0xf8] sm:$0xff]   ;;  %v2848_v62 = vld [vmem:[#allocation5 + $0x140] sm:$0xff]  }
  0x43   :  { %301 = vperm.xlu1 %2792, %v3146_v4   ;;  %298 = vperm.xlu0 %2791, %v3144_v3   ;;  %v2846_v61 = vld [vmem:[#allocation5 + $0xb8] sm:$0xff]   ;;  %v2847_v63 = vld [vmem:[#allocation5 + $0x100] sm:$0xff]   ;;  %v2850_v0 = vld [vmem:[#allocation5 + $0x148] sm:$0xff]  }
  0x44   :  { %2427 = vmatpush3.bf16.msra.mxu0 %v2819_v9  ;;  %2447 = vmatpush3.bf16.msra.mxu1 %v2820_v10  ;;  %v2849_v1 = vld [vmem:[#allocation5 + $0x108] sm:$0xff]   ;;  %v2854_v5 = vld [vmem:[#allocation5 + $0x158] sm:$0xff]   ;;  %v2856_v7 = vld [vmem:[#allocation5 + $0x160] sm:$0xff]  }
  0x45   :  { %2428 = vmatprep.subr.bf16.mxu0 %v3054_v2  ;;  %2448 = vmatprep.subr.bf16.mxu1 %v3054_v2  ;;  %v2853_v6 = vld [vmem:[#allocation5 + $0x118] sm:$0xff]   ;;  %v2855_v9 = vld [vmem:[#allocation5 + $0x120] sm:$0xff]   ;;  %v2858_v10 = vld [vmem:[#allocation5 + $0x168] sm:$0xff]  }
  0x46   :  { %v2857_v11 = vld [vmem:[#allocation5 + $0x128] sm:$0xff]  }
  0x47   :  { %2793 = vset.pattern.permute.xlu1 %v3057_v14  ;;  %2794 = vset.pattern.permute.xlu0 %v3057_v14  ;;  %v2859_v14 = vld [vmem:[#allocation5 + $0x130] sm:$0xff]  }
  0x48   :  { %417 = vperm.xlu1 %2793, %v3144_v3   ;;  %420 = vperm.xlu0 %2794, %v3146_v4  }
  0x49   :  { %2429 = vmatpush3.bf16.msra.mxu0 %v2821_v12  ;;  %2449 = vmatpush3.bf16.msra.mxu1 %v2822_v13  ;;  %v2860_v13 = vld [vmem:[#allocation5 + $0x170] sm:$0xff]  }
  0x4a   :  { %2430 = vmatprep.subr.bf16.mxu0 %v3054_v2  ;;  %2450 = vmatprep.subr.bf16.mxu1 %v3054_v2 }
  0x4c   :  { %2795 = vset.pattern.permute.xlu1 %v3058_v17  ;;  %2796 = vset.pattern.permute.xlu0 %v3059_v18  ;;  %v2862_v17 = vld [vmem:[#allocation5 + $0x178] sm:$0xff]  }
  0x4d   :  { %536 = vperm.xlu1 %2795, %v3144_v3   ;;  %655 = vperm.xlu0 %2796, %v3144_v3  }
  0x4e   :  { %2431 = vmatpush3.bf16.msra.mxu0 %v2823_v15  ;;  %2451 = vmatpush3.bf16.msra.mxu1 %v2824_v16 }
  0x4f   :  { %2432 = vmatprep.subr.bf16.mxu0 %v3054_v2  ;;  %2452 = vmatprep.subr.bf16.mxu1 %v3054_v2 }
  0x51   :  { %539 = vperm.xlu1 %2795, %v3146_v4   ;;  %2799 = vset.pattern.permute.xlu0 %v3060_v21 }
  0x52   :  { %777 = vperm.xlu0 %2799, %v3146_v4   ;;  %2433 = vmatpush3.bf16.msra.mxu0 %v2825_v19  ;;  %v2864_v19 = vld [vmem:[#allocation5 + $0x1c0] sm:$0xff]  }
  0x53   :  { %2453 = vmatpush3.bf16.msra.mxu1 %v2826_v20  ;;  %2434 = vmatprep.subr.bf16.mxu0 %v3054_v2  ;;  %v2863_v20 = vld [vmem:[#allocation5 + $0x180] sm:$0xff]  }
  0x54   :  { %2454 = vmatprep.subr.bf16.mxu1 %v3054_v2 }
  0x55   :  { %2797 = vset.pattern.permute.xlu1 %v3059_v18  ;;  %v2861_v18 = vld [vmem:[#allocation5 + $0x138] sm:$0xff]  }
  0x56   :  { %658 = vperm.xlu1 %2797, %v3146_v4   ;;  %2801 = vset.pattern.permute.xlu0 %v3061_v24 }
  0x57   :  { %2435 = vmatpush3.bf16.msra.mxu0 %v2827_v22  ;;  %2455 = vmatpush3.bf16.msra.mxu1 %v2828_v23  ;;  %v2865_v22 = vld [vmem:[#allocation5 + $0x188] sm:$0xff]   ;;  %v2868_v23 = vld [vmem:[#allocation5 + $0x1d0] sm:$0xff]  }
  0x58   :  { %1012 = vperm.xlu0 %2801, %v3144_v3   ;;  %2436 = vmatprep.subr.bf16.mxu0 %v3054_v2 }
  0x59   :  { %2456 = vmatprep.subr.bf16.mxu1 %v3054_v2 }
  0x5a   :  { %2798 = vset.pattern.permute.xlu1 %v3060_v21  ;;  %v2866_v21 = vld [vmem:[#allocation5 + $0x1c8] sm:$0xff]  }
  0x5b   :  { %774 = vperm.xlu1 %2798, %v3144_v3   ;;  %2437 = vmatpush3.bf16.msra.mxu0 %v2829_v25  ;;  %v2870_v25 = vld [vmem:[#allocation5 + $0x1d8] sm:$0xff]  }
  0x5c   :  { %2457 = vmatpush3.bf16.msra.mxu1 %v2830_v26  ;;  %2804 = vset.pattern.permute.xlu0 %v3062_v27  ;;  %v2869_v26 = vld [vmem:[#allocation5 + $0x198] sm:$0xff]  }
  0x5d   :  { %1134 = vperm.xlu0 %2804, %v3146_v4   ;;  %2462 = vmatprep.subr.bf16.mxu0 %v3054_v2 }
  0x5e   :  { %2482 = vmatprep.subr.bf16.mxu1 %v3054_v2 }
  0x5f   :  { %2800 = vset.pattern.permute.xlu1 %v3063_v28  ;;  %v2872_v28 = vld [vmem:[#allocation5 + $0x1e0] sm:$0xff]  }
  0x60   :  { %893 = vperm.xlu1 %2800, %v3144_v3  }
  0x61   :  { %2806 = vset.pattern.permute.xlu0 %v3064_v29 }
  0x62   :  { %1369 = vperm.xlu0 %2806, %v3144_v3  }
  0x64   :  { %896 = vperm.xlu1 %2800, %v3146_v4  }
  0x66   :  { %2809 = vset.pattern.permute.xlu0 %v3066_v31 }
  0x67   :  { %1491 = vperm.xlu0 %2809, %v3146_v4  }
  0x68   :  { %2802 = vset.pattern.permute.xlu1 %v3061_v24  ;;  %v2867_v24 = vld [vmem:[#allocation5 + $0x190] sm:$0xff]  }
  0x69   :  { %1015 = vperm.xlu1 %2802, %v3146_v4  }
  0x6b   :  { %2811 = vset.pattern.permute.xlu0 %v3068_v33 }
  0x6c   :  { %1726 = vperm.xlu0 %2811, %v3144_v3  }
  0x6d   :  { %2803 = vset.pattern.permute.xlu1 %v3062_v27 }
  0x6e   :  { %1131 = vperm.xlu1 %2803, %v3144_v3  }
  0x70   :  { %2814 = vset.pattern.permute.xlu0 %v3069_v34 }
  0x71   :  { %1848 = vperm.xlu0 %2814, %v3146_v4  }
  0x72   :  { %2805 = vset.pattern.permute.xlu1 %v3065_v30  ;;  %v2874_v30 = vld [vmem:[#allocation5 + $0x1e8] sm:$0xff]  }
  0x73   :  { %1250 = vperm.xlu1 %2805, %v3144_v3  }
  0x77   :  { %1253 = vperm.xlu1 %2805, %v3146_v4  }
  0x7b   :  { %2807 = vset.pattern.permute.xlu1 %v3064_v29  ;;  %v2871_v29 = vld [vmem:[#allocation5 + $0x1a0] sm:$0xff]  }
  0x7c   :  { %1372 = vperm.xlu1 %2807, %v3146_v4  }
  0x80   :  { %2808 = vset.pattern.permute.xlu1 %v3066_v31 }
  0x81   :  { %1488 = vperm.xlu1 %2808, %v3144_v3  }
  0x85   :  { %2810 = vset.pattern.permute.xlu1 %v3067_v32  ;;  %v2873_v32 = vld [vmem:[#allocation5 + $0x1a8] sm:$0xff]  }
  0x86   :  { %1607 = vperm.xlu1 %2810, %v3144_v3  }
  0x8a   :  { %1610 = vperm.xlu1 %2810, %v3146_v4  }
  0x8e   :  { %2812 = vset.pattern.permute.xlu1 %v3068_v33  ;;  %v2876_v33 = vld [vmem:[#allocation5 + $0x1f0] sm:$0xff]  }
  0x8f   :  { %1729 = vperm.xlu1 %2812, %v3146_v4   ;;  %v2851_v4 = vld [vmem:[#allocation5 + $0x110] sm:$0xff]  }
  0x93   :  { %2813 = vset.pattern.permute.xlu1 %v3069_v34  ;;  %v2875_v34 = vld [vmem:[#allocation5 + $0x1b0] sm:$0xff]  }
  0x94   :  { %1845 = vperm.xlu1 %2813, %v3144_v3   ;;  %v2852_v3 = vld [vmem:[#allocation5 + $0x150] sm:$0xff]  }
  0xb9   :  { %v66_v36 = vpop.permute.xlu1 %65  ;;  %v93_v37 = vpop.permute.xlu0 %92 }
  0xba   :  { %vm70_vm1 = vcmp.eq.s32.totalorder %v3200_v38, %v66_v36  ;;  %vm97_vm4 = vcmp.eq.s32.totalorder %v3200_v38, %v93_v37  ;;  %v2878_v36 = vld [vmem:[#allocation5 + $0x1f8] sm:$0xff]  }
  0xbd   :  { %v69_v39 = vpop.permute.xlu1 %68  ;;  %v96_v40 = vpop.permute.xlu0 %95 }
  0xbe   :  { %vm71_vm2 = vcmp.eq.s32.totalorder %v3200_v38, %v69_v39  ;;  %vm98_vm3 = vcmp.eq.s32.totalorder %v3200_v38, %v96_v40  ;;  %v2877_v39 = vld [vmem:[#allocation5 + $0x1b8] sm:$0xff]   ;;  %v2880_v40 = vld [vmem:[#allocation5 + $0x240] sm:$0xff]  }
  0xbf   :  { %vm2118_vm5 = vmpackc.low %vm71_vm2, %vm70_vm1 }
  0xc0   :  { %vm2108_vm6 = vmpackc.low %vm98_vm3, %vm97_vm4  ;;  %2459 = vmatmul.mubr.msk.bf16.vlgmr.msra.gmra.mrb[0].mxu1 %vm2118_vm5, %v3070_v43 }
  0xc1   :  { %2439 = vmatmul.mubr.msk.bf16.vlgmr.msra.gmra.mrb[0].mxu0 %vm2108_vm6, %v3070_v43  ;;  %2483 = vmatpush3.bf16.msra.mxu1 %v2832_v41  ;;  %v2879_v41 = vld [vmem:[#allocation5 + $0x200] sm:$0xff]  }
  0xc2   :  { %2463 = vmatpush3.bf16.msra.mxu0 %v2831_v42  ;;  %2484 = vmatprep.subr.bf16.mxu1 %v3054_v2  ;;  %v302_v53 = vpop.permute.xlu1 %301  ;;  %v299_v54 = vpop.permute.xlu0 %298  ;;  %v2882_v42 = vld [vmem:[#allocation5 + $0x248] sm:$0xff]  }
  0xc3   :  { %2464 = vmatprep.subr.bf16.mxu0 %v3054_v2  ;;  %2478 = vmatprep.mubr.msk.bf16.mxu0 %vm3055_vm0, %v3054_v2  ;;  %vm304_vm9 = vcmp.eq.s32.totalorder %v3200_v38, %v302_v53  ;;  %vm303_vm10 = vcmp.eq.s32.totalorder %v3200_v38, %v299_v54  ;;  %v2889_v54 = vld [vmem:[#allocation5 + $0x228] sm:$0xff]  }
  0xc4   :  { %2498 = vmatprep.mubr.msk.bf16.mxu1 %vm3055_vm0, %v3054_v2  ;;  %vm2128_vm12 = vmpackc.low %vm304_vm9, %vm303_vm10 }
  0xc5   :  { %2485 = vmatpush3.bf16.msra.mxu1 %v2834_v44  ;;  %v2881_v44 = vld [vmem:[#allocation5 + $0x208] sm:$0xff]  }
  0xc6   :  { %2465 = vmatpush3.bf16.msra.mxu0 %v2833_v45  ;;  %2486 = vmatprep.subr.bf16.mxu1 %v3054_v2  ;;  %v2884_v45 = vld [vmem:[#allocation5 + $0x250] sm:$0xff]  }
  0xc7   :  { %2466 = vmatprep.subr.bf16.mxu0 %v3054_v2  ;;  %v418_v58 = vpop.permute.xlu1 %417  ;;  %v421_v59 = vpop.permute.xlu0 %420 }
  0xc8   :  { %vm422_vm7 = vcmp.eq.s32.totalorder %v3200_v38, %v418_v58  ;;  %vm423_vm8 = vcmp.eq.s32.totalorder %v3200_v38, %v421_v59  ;;  %v2894_v59 = vld [vmem:[#allocation5 + $0x278] sm:$0xff]  }
  0xc9   :  { %2487 = vmatpush3.bf16.msra.mxu1 %v2836_v46  ;;  %vm2138_vm11 = vmpackc.low %vm423_vm8, %vm422_vm7  ;;  %v2883_v46 = vld [vmem:[#allocation5 + $0x210] sm:$0xff]  }
  0xca   :  { %2467 = vmatpush3.bf16.msra.mxu0 %v2835_v47  ;;  %2488 = vmatprep.subr.bf16.mxu1 %v3054_v2  ;;  %v2886_v47 = vld [vmem:[#allocation5 + $0x258] sm:$0xff]  }
  0xcb   :  { %2468 = vmatprep.subr.bf16.mxu0 %v3054_v2 }
  0xcc   :  { %v537_v8 = vpop.permute.xlu1 %536  ;;  %v656_v16 = vpop.permute.xlu0 %655 }
  0xcd   :  { %2489 = vmatpush3.bf16.msra.mxu1 %v2838_v48  ;;  %vm660_vm14 = vcmp.eq.s32.totalorder %v3200_v38, %v656_v16  ;;  %vm541_vm15 = vcmp.eq.s32.totalorder %v3200_v38, %v537_v8  ;;  %v2885_v48 = vld [vmem:[#allocation5 + $0x218] sm:$0xff]   ;;  %v2903_v8 = vld [vmem:[#allocation5 + $0x2a0] sm:$0xff]  }
  0xce   :  { %2469 = vmatpush3.bf16.msra.mxu0 %v2837_v49  ;;  %2490 = vmatprep.subr.bf16.mxu1 %v3054_v2  ;;  %v2888_v49 = vld [vmem:[#allocation5 + $0x260] sm:$0xff]   ;;  %v2910_v16 = vld [vmem:[#allocation5 + $0x2f8] sm:$0xff]  }
  0xcf   :  { %2470 = vmatprep.subr.bf16.mxu0 %v3054_v2 }
  0xd0   :  { %v540_v12 = vpop.permute.xlu1 %539 }
  0xd1   :  { %2491 = vmatpush3.bf16.msra.mxu1 %v2840_v50  ;;  %vm542_vm1 = vcmp.eq.s32.totalorder %v3200_v38, %v540_v12  ;;  %v778_v37 = vpop.permute.xlu0 %777  ;;  %v2887_v50 = vld [vmem:[#allocation5 + $0x220] sm:$0xff]   ;;  %v2908_v12 = vld [vmem:[#allocation5 + $0x2f0] sm:$0xff]  }
  0xd2   :  { %2471 = vmatpush3.bf16.msra.mxu0 %v2839_v51  ;;  %2492 = vmatprep.subr.bf16.mxu1 %v3054_v2  ;;  %vm2148_vm3 = vmpackc.low %vm542_vm1, %vm541_vm15  ;;  %vm780_vm7 = vcmp.eq.s32.totalorder %v3200_v38, %v778_v37  ;;  %v2890_v51 = vld [vmem:[#allocation5 + $0x268] sm:$0xff]   ;;  %v2925_v37 = vld [vmem:[#allocation5 + $0x338] sm:$0xff]  }
  0xd3   :  { %2472 = vmatprep.subr.bf16.mxu0 %v3054_v2 }
  0xd5   :  { %2493 = vmatpush3.bf16.msra.mxu1 %v2842_v52  ;;  %v659_v15 = vpop.permute.xlu1 %658 }
  0xd6   :  { %2473 = vmatpush3.bf16.msra.mxu0 %v2841_v55  ;;  %2494 = vmatprep.subr.bf16.mxu1 %v3054_v2  ;;  %vm661_vm13 = vcmp.eq.s32.totalorder %v3200_v38, %v659_v15  ;;  %v2892_v55 = vld [vmem:[#allocation5 + $0x270] sm:$0xff]  }
  0xd7   :  { %2474 = vmatprep.subr.bf16.mxu0 %v3054_v2  ;;  %vm2158_vm2 = vmpackc.low %vm661_vm13, %vm660_vm14  ;;  %v1013_v53 = vpop.permute.xlu0 %1012 }
  0xd8   :  { %vm1017_vm13 = vcmp.eq.s32.totalorder %v3200_v38, %v1013_v53  ;;  %v2937_v53 = vld [vmem:[#allocation5 + $0x3a8] sm:$0xff]  }
  0xd9   :  { %2495 = vmatpush3.bf16.msra.mxu1 %v2843_v56  ;;  %v2891_v56 = vld [vmem:[#allocation5 + $0x230] sm:$0xff]  }
  0xda   :  { %2475 = vmatpush3.bf16.msra.mxu0 %v2844_v57  ;;  %2496 = vmatprep.subr.bf16.mxu1 %v3054_v2  ;;  %v775_v27 = vpop.permute.xlu1 %774 }
  0xdb   :  { %2476 = vmatprep.subr.bf16.mxu0 %v3054_v2  ;;  %vm779_vm6 = vcmp.eq.s32.totalorder %v3200_v38, %v775_v27  ;;  %v2920_v27 = vld [vmem:[#allocation5 + $0x360] sm:$0xff]  }
  0xdc   :  { %vm2168_vm9 = vmpackc.low %vm780_vm7, %vm779_vm6  ;;  %v1135_v58 = vpop.permute.xlu0 %1134 }
  0xdd   :  { %2497 = vmatpush3.bf16.msra.mxu1 %v2845_v60  ;;  %v2893_v60 = vld [vmem:[#allocation5 + $0x238] sm:$0xff]  }
  0xde   :  { %2477 = vmatpush3.bf16.msra.mxu0 %v2846_v61  ;;  %2522 = vmatprep.subr.bf16.mxu1 %v3054_v2  ;;  %v2896_v61 = vld [vmem:[#allocation5 + $0x2c0] sm:$0xff]  }
  0xdf   :  { %2502 = vmatprep.subr.bf16.mxu0 %v3054_v2  ;;  %v894_v31 = vpop.permute.xlu1 %893 }
  0xe0   :  { %2499 = vmatmul.mubr.msk.bf16.vlgmr.msra.gmra.mrb[4].mxu1 %vm2138_vm11, %v3070_v43  ;;  %vm898_vm4 = vcmp.eq.s32.totalorder %v3200_v38, %v894_v31  ;;  %vm1137_vm11 = vcmp.eq.s32.totalorder %v3200_v38, %v1135_v58  ;;  %v2921_v31 = vld [vmem:[#allocation5 + $0x328] sm:$0xff]  }
  0xe1   :  { %2479 = vmatmul.mubr.msk.bf16.vlgmr.msra.gmra.mrb[4].mxu0 %vm2128_vm12, %v3070_v43  ;;  %2523 = vmatpush3.bf16.msra.mxu1 %v2848_v62  ;;  %v2895_v62 = vld [vmem:[#allocation5 + $0x280] sm:$0xff]   ;;  %v1370_v15 = vpop.permute.xlu0 %1369 }
  0xe2   :  { %2503 = vmatpush3.bf16.msra.mxu0 %v2847_v63  ;;  %2524 = vmatprep.subr.bf16.mxu1 %v3054_v2  ;;  %v2898_v63 = vld [vmem:[#allocation5 + $0x2c8] sm:$0xff]  }
  0xe3   :  { %2504 = vmatprep.subr.bf16.mxu0 %v3054_v2  ;;  %2518 = vmatprep.mubr.msk.bf16.mxu0 %vm3055_vm0, %v3054_v2  ;;  %v897_v35 = vpop.permute.xlu1 %896 }
  0xe4   :  { %2538 = vmatprep.mubr.msk.bf16.mxu1 %vm3055_vm0, %v3054_v2  ;;  %vm899_vm5 = vcmp.eq.s32.totalorder %v3200_v38, %v897_v35  ;;  %v2926_v35 = vld [vmem:[#allocation5 + $0x378] sm:$0xff]  }
  0xe5   :  { %2525 = vmatpush3.bf16.msra.mxu1 %v2850_v0  ;;  %vm2178_vm8 = vmpackc.low %vm899_vm5, %vm898_vm4  ;;  %v2897_v0 = vld [vmem:[#allocation5 + $0x288] sm:$0xff]  }
  0xe6   :  { %2505 = vmatpush3.bf16.msra.mxu0 %v2849_v1  ;;  %2526 = vmatprep.subr.bf16.mxu1 %v3054_v2  ;;  %v2900_v1 = vld [vmem:[#allocation5 + $0x2d0] sm:$0xff]  }
  0xe7   :  { %2506 = vmatprep.subr.bf16.mxu0 %v3054_v2 }
  0xe8   :  { %v1016_v52 = vpop.permute.xlu1 %1015 }
  0xe9   :  { %2527 = vmatpush3.bf16.msra.mxu1 %v2852_v3  ;;  %vm1018_vm12 = vcmp.eq.s32.totalorder %v3200_v38, %v1016_v52  ;;  %v2899_v3 = vld [vmem:[#allocation5 + $0x290] sm:$0xff]  }
  0xea   :  { %2507 = vmatpush3.bf16.msra.mxu0 %v2851_v4  ;;  %2528 = vmatprep.subr.bf16.mxu1 %v3054_v2  ;;  %vm2188_vm15 = vmpackc.low %vm1018_vm12, %vm1017_vm13  ;;  %v2902_v4 = vld [vmem:[#allocation5 + $0x2d8] sm:$0xff]  }
  0xeb   :  { %2508 = vmatprep.subr.bf16.mxu0 %v3054_v2 }
  0xed   :  { %2529 = vmatpush3.bf16.msra.mxu1 %v2854_v5  ;;  %v1132_v57 = vpop.permute.xlu1 %1131  ;;  %v2901_v5 = vld [vmem:[#allocation5 + $0x298] sm:$0xff]  }
  0xee   :  { %2509 = vmatpush3.bf16.msra.mxu0 %v2853_v6  ;;  %2530 = vmatprep.subr.bf16.mxu1 %v3054_v2  ;;  %vm1136_vm10 = vcmp.eq.s32.totalorder %v3200_v38, %v1132_v57  ;;  %v2904_v6 = vld [vmem:[#allocation5 + $0x2e0] sm:$0xff]  }
  0xef   :  { %2510 = vmatprep.subr.bf16.mxu0 %v3054_v2  ;;  %vm2198_vm14 = vmpackc.low %vm1137_vm11, %vm1136_vm10 }
  0xf1   :  { %2531 = vmatpush3.bf16.msra.mxu1 %v2856_v7 }
  0xf2   :  { %2511 = vmatpush3.bf16.msra.mxu0 %v2855_v9  ;;  %2532 = vmatprep.subr.bf16.mxu1 %v3054_v2  ;;  %v1251_v7 = vpop.permute.xlu1 %1250  ;;  %v2906_v9 = vld [vmem:[#allocation5 + $0x2e8] sm:$0xff]  }
  0xf3   :  { %2512 = vmatprep.subr.bf16.mxu0 %v3054_v2 }
  0xf5   :  { %2533 = vmatpush3.bf16.msra.mxu1 %v2858_v10  ;;  %v2905_v10 = vld [vmem:[#allocation5 + $0x2a8] sm:$0xff]  }
  0xf6   :  { %2513 = vmatpush3.bf16.msra.mxu0 %v2857_v11  ;;  %2534 = vmatprep.subr.bf16.mxu1 %v3054_v2  ;;  %v1254_v11 = vpop.permute.xlu1 %1253 }
  0xf7   :  { %2514 = vmatprep.subr.bf16.mxu0 %v3054_v2  ;;  %vm1256_vm4 = vcmp.eq.s32.totalorder %v3200_v38, %v1254_v11 }
  0xf9   :  { %2535 = vmatpush3.bf16.msra.mxu1 %v2860_v13  ;;  %v2907_v13 = vld [vmem:[#allocation5 + $0x2b0] sm:$0xff]  }
  0xfa   :  { %2515 = vmatpush3.bf16.msra.mxu0 %v2859_v14  ;;  %2536 = vmatprep.subr.bf16.mxu1 %v3054_v2 }
  0xfb   :  { %2516 = vmatprep.subr.bf16.mxu0 %v3054_v2  ;;  %v1373_v14 = vpop.permute.xlu1 %1372 }
  0xfc   :  { %vm1375_vm1 = vcmp.eq.s32.totalorder %v3200_v38, %v1373_v14 }
  0xfd   :  { %2537 = vmatpush3.bf16.msra.mxu1 %v2862_v17  ;;  %v2909_v17 = vld [vmem:[#allocation5 + $0x2b8] sm:$0xff]  }
  0xfe   :  { %2517 = vmatpush3.bf16.msra.mxu0 %v2861_v18  ;;  %2562 = vmatprep.subr.bf16.mxu1 %v3054_v2  ;;  %v2912_v18 = vld [vmem:[#allocation5 + $0x340] sm:$0xff]  }
  0xff   :  { %2542 = vmatprep.subr.bf16.mxu0 %v3054_v2 }
 0x100   :  { %2539 = vmatmul.mubr.msk.bf16.vlgmr.msra.gmra.mrb[8].mxu1 %vm2158_vm2, %v3070_v43  ;;  %vm1374_vm2 = vcmp.eq.s32.totalorder %v3200_v38, %v1370_v15 }
 0x101   :  { %2519 = vmatmul.mubr.msk.bf16.vlgmr.msra.gmra.mrb[8].mxu0 %vm2148_vm3, %v3070_v43  ;;  %2563 = vmatpush3.bf16.msra.mxu1 %v2864_v19  ;;  %vm1255_vm3 = vcmp.eq.s32.totalorder %v3200_v38, %v1251_v7  ;;  %vm2218_vm5 = vmpackc.low %vm1375_vm1, %vm1374_vm2  ;;  %v2911_v19 = vld [vmem:[#allocation5 + $0x300] sm:$0xff]  }
 0x102   :  { %2543 = vmatpush3.bf16.msra.mxu0 %v2863_v20  ;;  %2564 = vmatprep.subr.bf16.mxu1 %v3054_v2  ;;  %vm2208_vm6 = vmpackc.low %vm1256_vm4, %vm1255_vm3  ;;  %v2914_v20 = vld [vmem:[#allocation5 + $0x348] sm:$0xff]  }
 0x103   :  { %2544 = vmatprep.subr.bf16.mxu0 %v3054_v2  ;;  %2558 = vmatprep.mubr.msk.bf16.mxu0 %vm3055_vm0, %v3054_v2 }
 0x104   :  { %2578 = vmatprep.mubr.msk.bf16.mxu1 %vm3055_vm0, %v3054_v2 }
 0x105   :  { %2565 = vmatpush3.bf16.msra.mxu1 %v2866_v21  ;;  %v2913_v21 = vld [vmem:[#allocation5 + $0x308] sm:$0xff]  }
 0x106   :  { %2545 = vmatpush3.bf16.msra.mxu0 %v2865_v22  ;;  %2566 = vmatprep.subr.bf16.mxu1 %v3054_v2  ;;  %v2916_v22 = vld [vmem:[#allocation5 + $0x350] sm:$0xff]  }
 0x107   :  { %2546 = vmatprep.subr.bf16.mxu0 %v3054_v2 }
 0x109   :  { %2567 = vmatpush3.bf16.msra.mxu1 %v2868_v23  ;;  %v2915_v23 = vld [vmem:[#allocation5 + $0x310] sm:$0xff]  }
 0x10a   :  { %2547 = vmatpush3.bf16.msra.mxu0 %v2867_v24  ;;  %2568 = vmatprep.subr.bf16.mxu1 %v3054_v2  ;;  %v2918_v24 = vld [vmem:[#allocation5 + $0x358] sm:$0xff]  }
 0x10b   :  { %2548 = vmatprep.subr.bf16.mxu0 %v3054_v2 }
 0x10d   :  { %2569 = vmatpush3.bf16.msra.mxu1 %v2870_v25  ;;  %v2917_v25 = vld [vmem:[#allocation5 + $0x318] sm:$0xff]  }
 0x10e   :  { %2549 = vmatpush3.bf16.msra.mxu0 %v2869_v26  ;;  %2570 = vmatprep.subr.bf16.mxu1 %v3054_v2  ;;  %v1489_v26 = vpop.permute.xlu1 %1488 }
 0x10f   :  { %2550 = vmatprep.subr.bf16.mxu0 %v3054_v2 }
 0x111   :  { %2571 = vmatpush3.bf16.msra.mxu1 %v2872_v28  ;;  %v2919_v28 = vld [vmem:[#allocation5 + $0x320] sm:$0xff]  }
 0x112   :  { %2551 = vmatpush3.bf16.msra.mxu0 %v2871_v29  ;;  %2572 = vmatprep.subr.bf16.mxu1 %v3054_v2  ;;  %v2922_v29 = vld [vmem:[#allocation5 + $0x368] sm:$0xff]  }
 0x113   :  { %2552 = vmatprep.subr.bf16.mxu0 %v3054_v2 }
 0x115   :  { %2573 = vmatpush3.bf16.msra.mxu1 %v2874_v30  ;;  %v1608_v30 = vpop.permute.xlu1 %1607 }
 0x116   :  { %2553 = vmatpush3.bf16.msra.mxu0 %v2873_v32  ;;  %2574 = vmatprep.subr.bf16.mxu1 %v3054_v2  ;;  %v2924_v32 = vld [vmem:[#allocation5 + $0x370] sm:$0xff]   ;;  %vm1612_vm7 = vcmp.eq.s32.totalorder %v3200_v38, %v1608_v30  ;;  %v2944_v30 = vld [vmem:[#allocation7 + $0x8] sm:$0xff]  }
 0x117   :  { %2554 = vmatprep.subr.bf16.mxu0 %v3054_v2 }
 0x119   :  { %2575 = vmatpush3.bf16.msra.mxu1 %v2876_v33  ;;  %v2923_v33 = vld [vmem:[#allocation5 + $0x330] sm:$0xff]  }
 0x11a   :  { %2555 = vmatpush3.bf16.msra.mxu0 %v2875_v34  ;;  %2576 = vmatprep.subr.bf16.mxu1 %v3054_v2  ;;  %v1611_v34 = vpop.permute.xlu1 %1610 }
 0x11b   :  { %2556 = vmatprep.subr.bf16.mxu0 %v3054_v2 }
 0x11d   :  { %2577 = vmatpush3.bf16.msra.mxu1 %v2878_v36  ;;  %v1492_v36 = vpop.permute.xlu0 %1491 }
 0x11e   :  { %2557 = vmatpush3.bf16.msra.mxu0 %v2877_v39  ;;  %2602 = vmatprep.subr.bf16.mxu1 %v3054_v2  ;;  %vm1494_vm10 = vcmp.eq.s32.totalorder %v3200_v38, %v1492_v36  ;;  %v2928_v39 = vld [vmem:[#allocation5 + $0x3c0] sm:$0xff]  }
 0x11f   :  { %2582 = vmatprep.subr.bf16.mxu0 %v3054_v2 }
 0x120   :  { %2579 = vmatmul.mubr.msk.bf16.vlgmr.msra.gmra.mrb[12].mxu1 %vm2178_vm8, %v3070_v43  ;;  %vm1613_vm8 = vcmp.eq.s32.totalorder %v3200_v38, %v1611_v34 }
 0x121   :  { %2559 = vmatmul.mubr.msk.bf16.vlgmr.msra.gmra.mrb[12].mxu0 %vm2168_vm9, %v3070_v43  ;;  %2603 = vmatpush3.bf16.msra.mxu1 %v2880_v40  ;;  %vm1493_vm9 = vcmp.eq.s32.totalorder %v3200_v38, %v1489_v26  ;;  %vm2238_vm11 = vmpackc.low %vm1613_vm8, %vm1612_vm7  ;;  %v2927_v40 = vld [vmem:[#allocation5 + $0x380] sm:$0xff]   ;;  %v1727_v52 = vpop.permute.xlu0 %1726 }
 0x122   :  { %2583 = vmatpush3.bf16.msra.mxu0 %v2879_v41  ;;  %2604 = vmatprep.subr.bf16.mxu1 %v3054_v2  ;;  %vm2228_vm12 = vmpackc.low %vm1494_vm10, %vm1493_vm9  ;;  %v2930_v41 = vld [vmem:[#allocation5 + $0x3c8] sm:$0xff]   ;;  %vm1731_vm1 = vcmp.eq.s32.totalorder %v3200_v38, %v1727_v52 }
 0x123   :  { %2584 = vmatprep.subr.bf16.mxu0 %v3054_v2  ;;  %2598 = vmatprep.mubr.msk.bf16.mxu0 %vm3055_vm0, %v3054_v2 }
 0x124   :  { %2618 = vmatprep.mubr.msk.bf16.mxu1 %vm3055_vm0, %v3054_v2 }
 0x125   :  { %2605 = vmatpush3.bf16.msra.mxu1 %v2882_v42  ;;  %v2929_v42 = vld [vmem:[#allocation5 + $0x388] sm:$0xff]  }
 0x126   :  { %2585 = vmatpush3.bf16.msra.mxu0 %v2881_v44  ;;  %2606 = vmatprep.subr.bf16.mxu1 %v3054_v2  ;;  %v2932_v44 = vld [vmem:[#allocation5 + $0x3d0] sm:$0xff]  }
 0x127   :  { %2586 = vmatprep.subr.bf16.mxu0 %v3054_v2 }
 0x129   :  { %2607 = vmatpush3.bf16.msra.mxu1 %v2884_v45  ;;  %v2931_v45 = vld [vmem:[#allocation5 + $0x390] sm:$0xff]  }
 0x12a   :  { %2587 = vmatpush3.bf16.msra.mxu0 %v2883_v46  ;;  %2608 = vmatprep.subr.bf16.mxu1 %v3054_v2  ;;  %v2934_v46 = vld [vmem:[#allocation5 + $0x3d8] sm:$0xff]  }
 0x12b   :  { %2588 = vmatprep.subr.bf16.mxu0 %v3054_v2 }
 0x12d   :  { %2609 = vmatpush3.bf16.msra.mxu1 %v2886_v47  ;;  %v2933_v47 = vld [vmem:[#allocation5 + $0x398] sm:$0xff]  }
 0x12e   :  { %2589 = vmatpush3.bf16.msra.mxu0 %v2885_v48  ;;  %2610 = vmatprep.subr.bf16.mxu1 %v3054_v2  ;;  %v2936_v48 = vld [vmem:[#allocation5 + $0x3e0] sm:$0xff]  }
 0x12f   :  { %2590 = vmatprep.subr.bf16.mxu0 %v3054_v2 }
 0x131   :  { %2611 = vmatpush3.bf16.msra.mxu1 %v2888_v49  ;;  %v1730_v49 = vpop.permute.xlu1 %1729 }
 0x132   :  { %2591 = vmatpush3.bf16.msra.mxu0 %v2887_v50  ;;  %2612 = vmatprep.subr.bf16.mxu1 %v3054_v2  ;;  %v2935_v50 = vld [vmem:[#allocation5 + $0x3a0] sm:$0xff]  }
 0x133   :  { %2592 = vmatprep.subr.bf16.mxu0 %v3054_v2 }
 0x135   :  { %2613 = vmatpush3.bf16.msra.mxu1 %v2890_v51  ;;  %v2938_v51 = vld [vmem:[#allocation5 + $0x3e8] sm:$0xff]  }
 0x136   :  { %2593 = vmatpush3.bf16.msra.mxu0 %v2889_v54  ;;  %2614 = vmatprep.subr.bf16.mxu1 %v3054_v2 }
 0x137   :  { %2594 = vmatprep.subr.bf16.mxu0 %v3054_v2 }
 0x139   :  { %2615 = vmatpush3.bf16.msra.mxu1 %v2892_v55  ;;  %v1846_v55 = vpop.permute.xlu1 %1845 }
 0x13a   :  { %2595 = vmatpush3.bf16.msra.mxu0 %v2891_v56  ;;  %2616 = vmatprep.subr.bf16.mxu1 %v3054_v2  ;;  %vm1850_vm13 = vcmp.eq.s32.totalorder %v3200_v38, %v1846_v55 }
 0x13b   :  { %2596 = vmatprep.subr.bf16.mxu0 %v3054_v2 }
 0x13d   :  { %2617 = vmatpush3.bf16.msra.mxu1 %v2894_v59 }
 0x13e   :  { %2597 = vmatpush3.bf16.msra.mxu0 %v2893_v60  ;;  %2642 = vmatprep.subr.bf16.mxu1 %v3054_v2 }
 0x13f   :  { %2622 = vmatprep.subr.bf16.mxu0 %v3054_v2 }
 0x140   :  { %2619 = vmatmul.mubr.msk.bf16.vlgmr.msra.gmra.mrb[16].mxu1 %vm2198_vm14, %v3070_v43 }
 0x141   :  { %2599 = vmatmul.mubr.msk.bf16.vlgmr.msra.gmra.mrb[16].mxu0 %vm2188_vm15, %v3070_v43  ;;  %2643 = vmatpush3.bf16.msra.mxu1 %v2896_v61  ;;  %v2940_v61 = vld [vmem:[#allocation5 + $0x3f0] sm:$0xff]   ;;  %vm1732_vm15 = vcmp.eq.s32.totalorder %v3200_v38, %v1730_v49 }
 0x142   :  { %2623 = vmatpush3.bf16.msra.mxu0 %v2895_v62  ;;  %2644 = vmatprep.subr.bf16.mxu1 %v3054_v2  ;;  %vm2248_vm3 = vmpackc.low %vm1732_vm15, %vm1731_vm1 }
 0x143   :  { %2624 = vmatprep.subr.bf16.mxu0 %v3054_v2  ;;  %2638 = vmatprep.mubr.msk.bf16.mxu0 %vm3055_vm0, %v3054_v2 }
 0x144   :  { %2658 = vmatprep.mubr.msk.bf16.mxu1 %vm3055_vm0, %v3054_v2 }
 0x145   :  { %2645 = vmatpush3.bf16.msra.mxu1 %v2898_v63 }
 0x146   :  { %2625 = vmatpush3.bf16.msra.mxu0 %v2897_v0  ;;  %2646 = vmatprep.subr.bf16.mxu1 %v3054_v2  ;;  %v2939_v0 = vld [vmem:[#allocation5 + $0x3b0] sm:$0xff]  }
 0x147   :  { %2626 = vmatprep.subr.bf16.mxu0 %v3054_v2 }
 0x149   :  { %2647 = vmatpush3.bf16.msra.mxu1 %v2900_v1 }
 0x14a   :  { %2627 = vmatpush3.bf16.msra.mxu0 %v2899_v3  ;;  %2648 = vmatprep.subr.bf16.mxu1 %v3054_v2 }
 0x14b   :  { %2628 = vmatprep.subr.bf16.mxu0 %v3054_v2 }
 0x14d   :  { %2649 = vmatpush3.bf16.msra.mxu1 %v2902_v4  ;;  %v1849_v4 = vpop.permute.xlu0 %1848 }
 0x14e   :  { %2629 = vmatpush3.bf16.msra.mxu0 %v2901_v5  ;;  %2650 = vmatprep.subr.bf16.mxu1 %v3054_v2  ;;  %v2942_v5 = vld [vmem:[#allocation5 + $0x3f8] sm:$0xff]   ;;  %vm1851_vm14 = vcmp.eq.s32.totalorder %v3200_v38, %v1849_v4 }
 0x14f   :  { %2630 = vmatprep.subr.bf16.mxu0 %v3054_v2  ;;  %vm2258_vm2 = vmpackc.low %vm1851_vm14, %vm1850_vm13 }
 0x151   :  { %2651 = vmatpush3.bf16.msra.mxu1 %v2904_v6  ;;  %v2941_v6 = vld [vmem:[#allocation5 + $0x3b8] sm:$0xff]  }
 0x152   :  { %2631 = vmatpush3.bf16.msra.mxu0 %v2903_v8  ;;  %2652 = vmatprep.subr.bf16.mxu1 %v3054_v2 }
 0x153   :  { %2632 = vmatprep.subr.bf16.mxu0 %v3054_v2 }
 0x155   :  { %2653 = vmatpush3.bf16.msra.mxu1 %v2906_v9 }
 0x156   :  { %2633 = vmatpush3.bf16.msra.mxu0 %v2905_v10  ;;  %2654 = vmatprep.subr.bf16.mxu1 %v3054_v2 }
 0x157   :  { %2634 = vmatprep.subr.bf16.mxu0 %v3054_v2 }
 0x159   :  { %2655 = vmatpush3.bf16.msra.mxu1 %v2908_v12 }
 0x15a   :  { %2635 = vmatpush3.bf16.msra.mxu0 %v2907_v13  ;;  %2656 = vmatprep.subr.bf16.mxu1 %v3054_v2 }
 0x15b   :  { %2636 = vmatprep.subr.bf16.mxu0 %v3054_v2 }
 0x15d   :  { %2657 = vmatpush3.bf16.msra.mxu1 %v2910_v16 }
 0x15e   :  { %2637 = vmatpush3.bf16.msra.mxu0 %v2909_v17  ;;  %2682 = vmatprep.subr.bf16.mxu1 %v3054_v2 }
 0x15f   :  { %2662 = vmatprep.subr.bf16.mxu0 %v3054_v2 }
 0x160   :  { %2659 = vmatmul.mubr.msk.bf16.vlgmr.msra.gmra.mrb[20].mxu1 %vm2218_vm5, %v3070_v43 }
 0x161   :  { %2639 = vmatmul.mubr.msk.bf16.vlgmr.msra.gmra.mrb[20].mxu0 %vm2208_vm6, %v3070_v43  ;;  %2683 = vmatpush3.bf16.msra.mxu1 %v2912_v18 }
 0x162   :  { %2663 = vmatpush3.bf16.msra.mxu0 %v2911_v19  ;;  %2684 = vmatprep.subr.bf16.mxu1 %v3054_v2 }
 0x163   :  { %2664 = vmatprep.subr.bf16.mxu0 %v3054_v2  ;;  %2678 = vmatprep.mubr.msk.bf16.mxu0 %vm3055_vm0, %v3054_v2 }
 0x164   :  { %2698 = vmatprep.mubr.msk.bf16.mxu1 %vm3055_vm0, %v3054_v2 }
 0x165   :  { %2685 = vmatpush3.bf16.msra.mxu1 %v2914_v20 }
 0x166   :  { %2665 = vmatpush3.bf16.msra.mxu0 %v2913_v21  ;;  %2686 = vmatprep.subr.bf16.mxu1 %v3054_v2 }
 0x167   :  { %2666 = vmatprep.subr.bf16.mxu0 %v3054_v2 }
 0x169   :  { %2687 = vmatpush3.bf16.msra.mxu1 %v2916_v22 }
 0x16a   :  { %2667 = vmatpush3.bf16.msra.mxu0 %v2915_v23  ;;  %2688 = vmatprep.subr.bf16.mxu1 %v3054_v2 }
 0x16b   :  { %2668 = vmatprep.subr.bf16.mxu0 %v3054_v2 }
 0x16d   :  { %2689 = vmatpush3.bf16.msra.mxu1 %v2918_v24 }
 0x16e   :  { %2669 = vmatpush3.bf16.msra.mxu0 %v2917_v25  ;;  %2690 = vmatprep.subr.bf16.mxu1 %v3054_v2 }
 0x16f   :  { %2670 = vmatprep.subr.bf16.mxu0 %v3054_v2 }
 0x171   :  { %2691 = vmatpush3.bf16.msra.mxu1 %v2920_v27 }
 0x172   :  { %2671 = vmatpush3.bf16.msra.mxu0 %v2919_v28  ;;  %2692 = vmatprep.subr.bf16.mxu1 %v3054_v2 }
 0x173   :  { %2672 = vmatprep.subr.bf16.mxu0 %v3054_v2 }
 0x175   :  { %2693 = vmatpush3.bf16.msra.mxu1 %v2922_v29  ;;  %v2943_v29 = vld [vmem:[#allocation7] sm:$0xff]  }
 0x176   :  { %2673 = vmatpush3.bf16.msra.mxu0 %v2921_v31  ;;  %2694 = vmatprep.subr.bf16.mxu1 %v3054_v2  ;;  %v2945_v31 = vld [vmem:[#allocation7 + $0x10] sm:$0xff]  }
 0x177   :  { %2674 = vmatprep.subr.bf16.mxu0 %v3054_v2 }
 0x179   :  { %2695 = vmatpush3.bf16.msra.mxu1 %v2924_v32  ;;  %v2946_v32 = vld [vmem:[#allocation7 + $0x18] sm:$0xff]  }
 0x17a   :  { %2675 = vmatpush3.bf16.msra.mxu0 %v2923_v33  ;;  %2696 = vmatprep.subr.bf16.mxu1 %v3054_v2  ;;  %v2947_v33 = vld [vmem:[#allocation7 + $0x20] sm:$0xff]  }
 0x17b   :  { %2676 = vmatprep.subr.bf16.mxu0 %v3054_v2 }
 0x17d   :  { %2697 = vmatpush3.bf16.msra.mxu1 %v2926_v35 }
 0x17e   :  { %2677 = vmatpush3.bf16.msra.mxu0 %v2925_v37  ;;  %2722 = vmatprep.subr.bf16.mxu1 %v3054_v2  ;;  %v2948_v37 = vld [vmem:[#allocation7 + $0x28] sm:$0xff]  }
 0x17f   :  { %2702 = vmatprep.subr.bf16.mxu0 %v3054_v2 }
 0x180   :  { %2699 = vmatmul.mubr.msk.bf16.vlgmr.msra.gmra.mrb[24].mxu1 %vm2238_vm11, %v3070_v43 }
 0x181   :  { %2679 = vmatmul.mubr.msk.bf16.vlgmr.msra.gmra.mrb[24].mxu0 %vm2228_vm12, %v3070_v43  ;;  %2723 = vmatpush3.bf16.msra.mxu1 %v2928_v39 }
 0x182   :  { %2703 = vmatpush3.bf16.msra.mxu0 %v2927_v40  ;;  %2724 = vmatprep.subr.bf16.mxu1 %v3054_v2 }
 0x183   :  { %2704 = vmatprep.subr.bf16.mxu0 %v3054_v2  ;;  %2718 = vmatprep.mubr.msk.bf16.mxu0 %vm3055_vm0, %v3054_v2 }
 0x184   :  { %2738 = vmatprep.mubr.msk.bf16.mxu1 %vm3055_vm0, %v3054_v2 }
 0x185   :  { %2725 = vmatpush3.bf16.msra.mxu1 %v2930_v41 }
 0x186   :  { %2705 = vmatpush3.bf16.msra.mxu0 %v2929_v42  ;;  %2726 = vmatprep.subr.bf16.mxu1 %v3054_v2 }
 0x187   :  { %2706 = vmatprep.subr.bf16.mxu0 %v3054_v2 }
 0x189   :  { %2727 = vmatpush3.bf16.msra.mxu1 %v2932_v44 }
 0x18a   :  { %2707 = vmatpush3.bf16.msra.mxu0 %v2931_v45  ;;  %2728 = vmatprep.subr.bf16.mxu1 %v3054_v2 }
 0x18b   :  { %2708 = vmatprep.subr.bf16.mxu0 %v3054_v2 }
 0x18d   :  { %2729 = vmatpush3.bf16.msra.mxu1 %v2934_v46 }
 0x18e   :  { %2709 = vmatpush3.bf16.msra.mxu0 %v2933_v47  ;;  %2730 = vmatprep.subr.bf16.mxu1 %v3054_v2 }
 0x18f   :  { %2710 = vmatprep.subr.bf16.mxu0 %v3054_v2 }
 0x191   :  { %2731 = vmatpush3.bf16.msra.mxu1 %v2936_v48  ;;  %v2949_v48 = vld [vmem:[#allocation7 + $0x30] sm:$0xff]  }
 0x192   :  { %2711 = vmatpush3.bf16.msra.mxu0 %v2935_v50  ;;  %2732 = vmatprep.subr.bf16.mxu1 %v3054_v2  ;;  %v2950_v50 = vld [vmem:[#allocation7 + $0x38] sm:$0xff]  }
 0x193   :  { %v290_v54 = vpop.f32.mrb[0].mxu1  ;;  %2712 = vmatprep.subr.bf16.mxu0 %v3054_v2 }
 0x194   :  { %v201_v56 = vpop.f32.mrb[0].mxu0  ;;  %v2460_v57 = vpop.f32.mrb[1].mxu1 }
 0x195   :  { %v291_v58 = vadd.f32 %v290_v54, %v201_v56  ;;  %v2440_v59 = vpop.f32.mrb[1].mxu0  ;;  %2733 = vmatpush3.bf16.msra.mxu1 %v2938_v51  ;;  %v293_v60 = vpop.f32.mrb[2].mxu1 }
 0x196   :  { %2713 = vmatpush3.bf16.msra.mxu0 %v2937_v53  ;;  %v204_v62 = vpop.f32.mrb[2].mxu0  ;;  %v2461_v63 = vpop.f32.mrb[3].mxu1  ;;  %2734 = vmatprep.subr.bf16.mxu1 %v3054_v2 }
 0x197   :  { %v294_v1 = vadd.f32 %v293_v60, %v204_v62  ;;  %v2441_v3 = vpop.f32.mrb[3].mxu0  ;;  %2714 = vmatprep.subr.bf16.mxu0 %v3054_v2 }
 0x199   :  { %2735 = vmatpush3.bf16.msra.mxu1 %v2940_v61 }
 0x19a   :  { %2715 = vmatpush3.bf16.msra.mxu0 %v2939_v0  ;;  %2736 = vmatprep.subr.bf16.mxu1 %v3054_v2 }
 0x19b   :  { %2716 = vmatprep.subr.bf16.mxu0 %v3054_v2 }
 0x19d   :  { %2737 = vmatpush3.bf16.msra.mxu1 %v2942_v5 }
 0x19e   :  { %2717 = vmatpush3.bf16.msra.mxu0 %v2941_v6 }
 0x19f   :  { %2742 = vmatprep.subr.bf16.mxu0 %v3054_v2 }
 0x1a0   :  { %2739 = vmatmul.mubr.msk.bf16.vlgmr.msra.gmra.mrb[28].mxu1 %vm2258_vm2, %v3070_v43 }
 0x1a1   :  { %2719 = vmatmul.mubr.msk.bf16.vlgmr.msra.gmra.mrb[28].mxu0 %vm2248_vm3, %v3070_v43 }
 0x1a2   :  { %2758 = vmatprep.mubr.msk.bf16.mxu0 %vm3055_vm0, %v3054_v2  ;;  %2743 = vmatpush3.bf16.msra.mxu0 %v2943_v29 }
 0x1a3   :  { %2744 = vmatprep.subr.bf16.mxu0 %v3054_v2 }
 0x1a6   :  { %2745 = vmatpush3.bf16.msra.mxu0 %v2944_v30 }
 0x1a7   :  { %2746 = vmatprep.subr.bf16.mxu0 %v3054_v2 }
 0x1aa   :  { %2747 = vmatpush3.bf16.msra.mxu0 %v2945_v31 }
 0x1ab   :  { %2748 = vmatprep.subr.bf16.mxu0 %v3054_v2 }
 0x1ae   :  { %2749 = vmatpush3.bf16.msra.mxu0 %v2946_v32 }
 0x1af   :  { %2750 = vmatprep.subr.bf16.mxu0 %v3054_v2 }
 0x1b2   :  { %2751 = vmatpush3.bf16.msra.mxu0 %v2947_v33 }
 0x1b3   :  { %v526_v7 = vpop.f32.mrb[4].mxu1  ;;  %2752 = vmatprep.subr.bf16.mxu0 %v3054_v2 }
 0x1b4   :  { %v407_v8 = vpop.f32.mrb[4].mxu0  ;;  %v2500_v9 = vpop.f32.mrb[5].mxu1 }
 0x1b5   :  { %v414_v10 = vadd.f32 %v407_v8, %v291_v58  ;;  %v2480_v11 = vpop.f32.mrb[5].mxu0  ;;  %v529_v12 = vpop.f32.mrb[6].mxu1 }
 0x1b6   :  { %v410_v38 = vpop.f32.mrb[6].mxu0  ;;  %v2501_v13 = vpop.f32.mrb[7].mxu1  ;;  %2753 = vmatpush3.bf16.msra.mxu0 %v2948_v37 }
 0x1b7   :  { %v533_v14 = vadd.f32 %v526_v7, %v414_v10  ;;  %v415_v15 = vadd.f32 %v410_v38, %v294_v1  ;;  %v2481_v16 = vpop.f32.mrb[7].mxu0  ;;  %2754 = vmatprep.subr.bf16.mxu0 %v3054_v2 }
 0x1b9   :  { %v534_v17 = vadd.f32 %v529_v12, %v415_v15 }
 0x1ba   :  { %2755 = vmatpush3.bf16.msra.mxu0 %v2949_v48 }
 0x1bb   :  { %2756 = vmatprep.subr.bf16.mxu0 %v3054_v2 }
 0x1be   :  { %2757 = vmatpush3.bf16.msra.mxu0 %v2950_v50 }
 0x1d3   :  { %v764_v18 = vpop.f32.mrb[8].mxu1 }
 0x1d4   :  { %v645_v19 = vpop.f32.mrb[8].mxu0  ;;  %v2540_v20 = vpop.f32.mrb[9].mxu1 }
 0x1d5   :  { %v652_v21 = vadd.f32 %v645_v19, %v533_v14  ;;  %v2520_v43 = vpop.f32.mrb[9].mxu0  ;;  %v767_v22 = vpop.f32.mrb[10].mxu1 }
 0x1d6   :  { %v648_v23 = vpop.f32.mrb[10].mxu0  ;;  %v2541_v24 = vpop.f32.mrb[11].mxu1 }
 0x1d7   :  { %v771_v25 = vadd.f32 %v764_v18, %v652_v21  ;;  %v653_v26 = vadd.f32 %v648_v23, %v534_v17  ;;  %v2521_v27 = vpop.f32.mrb[11].mxu0 }
 0x1d8   :  { %v2260_v27 = vld [vmem:[%s3418_s2] ss:$0 sm:$0xff]  ;;  %s3017_s2 = scalar_lea.vmem %s2088_s29, 256 }
 0x1d9   :  { %v772_v28 = vadd.f32 %v767_v22, %v653_v26  ;;  %p3018_p10 = scmp.ne.s32.totalorder %s2088_s29, %s3017_s2  ;;  %p3023_p12 = scmp.lt.s32.totalorder %s3017_s2, %s3017_s2 }
 0x1db   :  { %p3024_p13 = por %p3023_p12, %p3022_p11 }
 0x1dd   :  { %p3025_p0 = pnand %p3024_p13, %p3018_p10 }
 0x1f3   :  { %v1002_v34 = vpop.f32.mrb[12].mxu1 }
 0x1f4   :  { %v883_v35 = vpop.f32.mrb[12].mxu0  ;;  %v2580_v36 = vpop.f32.mrb[13].mxu1 }
 0x1f5   :  { %v890_v39 = vadd.f32 %v883_v35, %v771_v25  ;;  %v2560_v40 = vpop.f32.mrb[13].mxu0  ;;  %v1005_v41 = vpop.f32.mrb[14].mxu1 }
 0x1f6   :  { %v886_v42 = vpop.f32.mrb[14].mxu0  ;;  %v2581_v44 = vpop.f32.mrb[15].mxu1 }
 0x1f7   :  { %v1009_v45 = vadd.f32 %v1002_v34, %v890_v39  ;;  %v891_v46 = vadd.f32 %v886_v42, %v772_v28  ;;  %v2561_v47 = vpop.f32.mrb[15].mxu0 }
 0x1f9   :  { %v1010_v49 = vadd.f32 %v1005_v41, %v891_v46 }
 0x213   :  { %v1240_v51 = vpop.f32.mrb[16].mxu1 }
 0x214   :  { %v1121_v52 = vpop.f32.mrb[16].mxu0  ;;  %v2620_v53 = vpop.f32.mrb[17].mxu1 }
 0x215   :  { %v1128_v54 = vadd.f32 %v1121_v52, %v1009_v45  ;;  %v2600_v55 = vpop.f32.mrb[17].mxu0  ;;  %v1243_v56 = vpop.f32.mrb[18].mxu1 }
 0x216   :  { %v1124_v57 = vpop.f32.mrb[18].mxu0  ;;  %v2621_v58 = vpop.f32.mrb[19].mxu1 }
 0x217   :  { %v1247_v59 = vadd.f32 %v1240_v51, %v1128_v54  ;;  %v1129_v60 = vadd.f32 %v1124_v57, %v1010_v49  ;;  %v2601_v61 = vpop.f32.mrb[19].mxu0 }
 0x219   :  { %v1248_v62 = vadd.f32 %v1243_v56, %v1129_v60 }
 0x233   :  { %v1478_v63 = vpop.f32.mrb[20].mxu1 }
 0x234   :  { %v1359_v0 = vpop.f32.mrb[20].mxu0  ;;  %v2660_v1 = vpop.f32.mrb[21].mxu1 }
 0x235   :  { %v1366_v3 = vadd.f32 %v1359_v0, %v1247_v59  ;;  %v2640_v4 = vpop.f32.mrb[21].mxu0  ;;  %v1481_v2 = vpop.f32.mrb[22].mxu1 }
 0x236   :  { %v1362_v5 = vpop.f32.mrb[22].mxu0  ;;  %v2661_v6 = vpop.f32.mrb[23].mxu1 }
 0x237   :  { %v1485_v7 = vadd.f32 %v1478_v63, %v1366_v3  ;;  %v1367_v8 = vadd.f32 %v1362_v5, %v1248_v62  ;;  %v2641_v9 = vpop.f32.mrb[23].mxu0 }
 0x239   :  { %v1486_v10 = vadd.f32 %v1481_v2, %v1367_v8 }
 0x253   :  { %v1716_v11 = vpop.f32.mrb[24].mxu1 }
 0x254   :  { %v1597_v12 = vpop.f32.mrb[24].mxu0  ;;  %v2700_v38 = vpop.f32.mrb[25].mxu1 }
 0x255   :  { %v1604_v13 = vadd.f32 %v1597_v12, %v1485_v7  ;;  %v2680_v14 = vpop.f32.mrb[25].mxu0  ;;  %v1719_v15 = vpop.f32.mrb[26].mxu1 }
 0x256   :  { %v1600_v16 = vpop.f32.mrb[26].mxu0  ;;  %v2701_v17 = vpop.f32.mrb[27].mxu1 }
 0x257   :  { %v1723_v18 = vadd.f32 %v1716_v11, %v1604_v13  ;;  %v1605_v19 = vadd.f32 %v1600_v16, %v1486_v10  ;;  %v2681_v20 = vpop.f32.mrb[27].mxu0 }
 0x259   :  { %v1724_v21 = vadd.f32 %v1719_v15, %v1605_v19 }
 0x273   :  { %v1954_v43 = vpop.f32.mrb[28].mxu1 }
 0x274   :  { %v1835_v22 = vpop.f32.mrb[28].mxu0  ;;  %v2740_v23 = vpop.f32.mrb[29].mxu1 }
 0x275   :  { %v1842_v24 = vadd.f32 %v1835_v22, %v1723_v18  ;;  %v2720_v25 = vpop.f32.mrb[29].mxu0  ;;  %v1957_v26 = vpop.f32.mrb[30].mxu1 }
 0x276   :  { %v1838_v28 = vpop.f32.mrb[30].mxu0  ;;  %v2741_v29 = vpop.f32.mrb[31].mxu1 }
 0x277   :  { %v1961_v30 = vadd.f32 %v1954_v43, %v1842_v24  ;;  %v1843_v31 = vadd.f32 %v1838_v28, %v1724_v21  ;;  %v2721_v32 = vpop.f32.mrb[31].mxu0 }
 0x279   :  { %v1970_v33 = vadd.f32 %v2260_v27, %v1961_v30  ;;  %v1962_v34 = vadd.f32 %v1957_v26, %v1843_v31 }
 0x27b   :  { %v1971_v35 = vadd.f32 %v2260_v27, %v1962_v34  ;;  %v1972_v36 = vmax.f32 %v1970_v33, 0.0 }
 0x27d   :  { %v1973_v37 = vmax.f32 %v1971_v35, 0.0 }
 0x27f   :  { %v1974_v39 = vpack.c.bf16 %v1973_v37, %v1972_v36 }
 0x281   :  { %2759 = vmatmul.mubr.bf16.vlgmr.msra.gmra.mrb[32].mxu0 %v1974_v39 }
 0x354   :  { %v2073_v40 = vpop.f32.mrb[32].mxu0 }
 0x355   :  { %2080 = vst [vmem:[#allocation8] sm:$0xff] %v2073_v40  ;;  %v2760_v41 = vpop.f32.mrb[33].mxu0 }
 0x356   :  { %v2076_v42 = vpop.f32.mrb[34].mxu0 }
 0x357   :  { %2081 = vst [vmem:[#allocation8 + $0x8] sm:$0xff] %v2076_v42  ;;  %v2761_v44 = vpop.f32.mrb[35].mxu0 }
 0x358   :  { %3028 = shalt.err (!%p3025_p0)
}
 0x359   :  { %s3029_s6 = scalar_lea.hbm %s3420_s4, 256 }
 0x35a   :  { %p3030_p1 = scmp.ne.s32.totalorder %s3420_s4, %s3029_s6  ;;  %p3033_p2 = scmp.lt.u32.totalorder %s3029_s6, %s3420_s4 }
 0x35c   :  { %p3035_p3 = pnand %p3033_p2, %p3030_p1 }
 0x35e   :  { %3038 = shalt.err (!%p3035_p3)
}
 0x35f   :  { %2093 = dma.vmem_to_hbm [thread:$0]  %s2088_s29, 256, %s3420_s4, [#allocation4], %s3049_s1, %s3049_s1, %s3050_s13  }
 0x360   :  { %3043 = dma.done.wait [#allocation4], 256  }
 0x361   :  { %3044 = vsyncadd [#allocation4], 4294967040 }
 0x362   :  { %2097 = vsyncpa [#allocation3], 1 }
 0x363   :  { %2098 = vsyncpa [#allocation6], 1 }
 0x364   :  { %2099 = vsyncpa [#allocation4], 1 }

</bundles_post_ra>
